<compile_context>
chip_gen: v5e
topology: v5e:2x2
jax: 0.10.0
libtpu: 0.0.40
codegen_flags: <defaults>
</compile_context>

<pallas_src>
import jax
import jax.numpy as jnp
from jax import lax
from jax.experimental import pallas as pl
from jax.experimental.pallas import tpu as pltpu


def _fused_table_kernel(p_i_ref, p_j_ref, a_i_ref, a_j_ref, ome_i_ref, ome_j_ref,
                        ra_ref, rd_ref):
    """One (TI, TJ) block of both output tables.

    p_i_ref   : (1, C, TI)  softmax class probs at the row pixels
    p_j_ref   : (1, C, TJ)  softmax class probs at the column pixels
    a_i_ref   : (1, 1, TI)  argmax class index of the row pixels    (int32)
    a_j_ref   : (1, 1, TJ)  argmax class index of the column pixels (int32)
    ome_i_ref : (1, TI, 1)  (1 - edge_prob) at the row pixels
    ome_j_ref : (1, 1, TJ)  (1 - edge_prob) at the column pixels
    ra_ref    : (1, TI, TJ) region_attention_tables block
    rd_ref    : (1, TI, TJ) region_dicision_tables block
    """
    p_i = p_i_ref[0]                                      # (C, TI)
    p_j = p_j_ref[0]                                      # (C, TJ)
    a_i = a_i_ref[0]                                      # (1, TI) int32
    a_j = a_j_ref[0]                                      # (1, TJ) int32
    c, ti = p_i.shape
    tj = p_j.shape[1]

    onehot_j = (lax.broadcasted_iota(jnp.int32, (c, tj), 0) == a_j).astype(jnp.float32)
    onehot_i = (lax.broadcasted_iota(jnp.int32, (c, ti), 0) == a_i).astype(jnp.float32)

    # MatchClass: semantic_tables[i, j] = P[argmax_class(j), i]
    sem_ij = lax.dot_general(p_i, onehot_j, (((0,), (0,)), ((), ())),
                             preferred_element_type=jnp.float32)      # (TI, TJ)
    # semantic_tables[j, i] = P[argmax_class(i), j]  (for the symmetrized table)
    sem_ji = lax.dot_general(onehot_i, p_j, (((0,), (0,)), ((), ())),
                             preferred_element_type=jnp.float32)      # (TI, TJ)

    # MatchBoundary: 1 - boundary_tables[i,j] = 1 - max(e_i, e_j) = min(1-e_i, 1-e_j)
    one_minus_bnd = jnp.minimum(ome_i_ref[0], ome_j_ref[0])           # (TI, TJ)

    ra = (1.0 - sem_ij) * one_minus_bnd
    rd = (1.0 - 0.5 * (sem_ij + sem_ji)) * one_minus_bnd

    ra_ref[0] = ra.astype(ra_ref.dtype)
    rd_ref[0] = rd.astype(rd_ref.dtype)


def _pick_tile(length, want, align):
    """Largest tile <= want that divides `length` and is a multiple of `align`,
    falling back to the full dimension (always legal for BlockSpec)."""
    if length <= want:
        return length
    t = (want // align) * align
    while t >= align:
        if length % t == 0:
            return t
        t -= align
    return length


def rcb_forward(semantic_score, boundary_score, *, ti=512, tj=512,
                out_dtype=jnp.float32):
    N, C, H, W = semantic_score.shape
    L = H * W
    # TI is reused as a LANE dim for the prob/argmax slabs, so align both tile
    # sizes to 128 (or collapse to the full L for small / awkward shapes).
    ti = _pick_tile(L, ti, 128)
    tj = _pick_tile(L, tj, 128)

    sem_flat = semantic_score.reshape(N, C, L).astype(jnp.float32)
    # Class softmax is computed once in the wrapper (O(N*C*L)), not per block.
    probs = jax.nn.softmax(sem_flat, axis=1)                        # (N, C, L)
    # argmax of softmax == argmax of raw logits (softmax is strictly monotone;
    # first-max tie-breaking matches torch.max / jnp.argmax).
    a_idx = jnp.argmax(sem_flat, axis=1).astype(jnp.int32).reshape(N, 1, L)

    # edge_prob = boundary_score.softmax(1)[:, 1, ...];  precompute 1 - edge.
    edge = jax.nn.softmax(boundary_score.astype(jnp.float32), axis=1)[:, 1, :, :]
    one_minus_edge = (1.0 - edge.reshape(N, L))
    ome_row = one_minus_edge.reshape(N, L, 1)
    ome_col = one_minus_edge.reshape(N, 1, L)

    grid = (N, L // ti, L // tj)

    # VMEM budget (double-buffered in/out blocks + headroom), capped so the same
    # code is safe on v7x's 64 MiB as well as v5e/v6e's 128 MiB.
    per_block_bytes = 4 * (2 * ti * tj          # two f32 output tiles
                           + C * (ti + tj)      # two prob slabs
                           + 2 * (ti + tj))     # argmax + edge vectors
    vmem_limit = int(min(max(4 * per_block_bytes, 16 * 1024 * 1024),
                         48 * 1024 * 1024))

    region_attention, region_decision = pl.pallas_call(
        _fused_table_kernel,
        out_shape=(jax.ShapeDtypeStruct((N, L, L), out_dtype),
                   jax.ShapeDtypeStruct((N, L, L), out_dtype)),
        grid_spec=pltpu.PrefetchScalarGridSpec(
            num_scalar_prefetch=0,
            grid=grid,
            in_specs=[
                pl.BlockSpec((1, C, ti), lambda n, i, j: (n, 0, i)),   # probs @ rows
                pl.BlockSpec((1, C, tj), lambda n, i, j: (n, 0, j)),   # probs @ cols
                pl.BlockSpec((1, 1, ti), lambda n, i, j: (n, 0, i)),   # argmax @ rows
                pl.BlockSpec((1, 1, tj), lambda n, i, j: (n, 0, j)),   # argmax @ cols
                pl.BlockSpec((1, ti, 1), lambda n, i, j: (n, i, 0)),   # 1-edge @ rows
                pl.BlockSpec((1, 1, tj), lambda n, i, j: (n, 0, j)),   # 1-edge @ cols
            ],
            out_specs=(pl.BlockSpec((1, ti, tj), lambda n, i, j: (n, i, j)),
                       pl.BlockSpec((1, ti, tj), lambda n, i, j: (n, i, j))),
        ),
        compiler_params=pltpu.CompilerParams(
            dimension_semantics=("parallel", "parallel", "parallel"),
            vmem_limit_bytes=vmem_limit),
    )(probs, probs, a_idx, a_idx, ome_row, ome_col)

    return region_attention, region_decision


def _reference(semantic_score, boundary_score):
    """Pure-JAX reference of the same (documented) semantics."""
    N, C, H, W = semantic_score.shape
    L = H * W
    sem_flat = semantic_score.reshape(N, C, L).astype(jnp.float32)
    probs = jax.nn.softmax(sem_flat, axis=1)                 # (N, C, L)
    a_idx = jnp.argmax(sem_flat, axis=1)                     # (N, L)
    edge = jax.nn.softmax(boundary_score.astype(jnp.float32), axis=1)[:, 1, :, :]
    edge = edge.reshape(N, L)
    # semantic_tables[n, i, j] = P[n, A[n, j], i]
    sem_tbl = jax.vmap(lambda p, a: p[a].T)(probs, a_idx)    # (N, L, L)
    bnd_tbl = jnp.maximum(edge[:, :, None], edge[:, None, :])
    ra = (1.0 - sem_tbl) * (1.0 - bnd_tbl)
    rd = (ra + jnp.swapaxes(ra, 1, 2)) * 0.5
    return ra, rd


if __name__ == "__main__":
    key = jax.random.PRNGKey(0)
    k1, k2 = jax.random.split(key)

    N, C, H, W = 2, 4, 16, 16          # small synthetic shapes; L = 256
    semantic_score = jax.random.normal(k1, (N, C, H, W), dtype=jnp.float32)
    boundary_score = jax.random.normal(k2, (N, 2, H, W), dtype=jnp.float32)

    # nn.Conv2d(1, 1, 1, bias=True) with constant init - present in __init__
    # but never called in forward(); kept only for parameter parity.
    conv_1x1_group_weight = jnp.ones((1, 1, 1, 1), jnp.float32)
    conv_1x1_group_bias = jnp.zeros((1,), jnp.float32)

    ra, rd = jax.jit(rcb_forward)(semantic_score, boundary_score)
    jax.block_until_ready((ra, rd))

    L = H * W
    assert ra.shape == (N, L, L) and rd.shape == (N, L, L)
    assert ra.dtype == jnp.float32 and rd.dtype == jnp.float32
    # symmetry of the decision tables
    assert jnp.allclose(rd, jnp.swapaxes(rd, 1, 2), atol=1e-6)
    # match the pure-JAX reference
    ra_ref, rd_ref = _reference(semantic_score, boundary_score)
    assert jnp.allclose(ra, ra_ref, atol=1e-5)
    assert jnp.allclose(rd, rd_ref, atol=1e-5)

    print("KERNEL_OK")
</pallas_src>

<mosaic_0001>
module attributes {stable_mosaic.version = 11 : i64} {
  func.func @_fused_table_kernel(%arg0: i32, %arg1: i32, %arg2: i32, %arg3: memref<1x4x256xf32, #tpu.memory_space<vmem>>, %arg4: memref<1x4x256xf32, #tpu.memory_space<vmem>>, %arg5: memref<1x1x256xi32, #tpu.memory_space<vmem>>, %arg6: memref<1x1x256xi32, #tpu.memory_space<vmem>>, %arg7: memref<1x256x1xf32, #tpu.memory_space<vmem>>, %arg8: memref<1x1x256xf32, #tpu.memory_space<vmem>>, %arg9: memref<1x256x256xf32, #tpu.memory_space<vmem>>, %arg10: memref<1x256x256xf32, #tpu.memory_space<vmem>>) attributes {dimension_semantics = [#tpu.dimension_semantics<parallel>, #tpu.dimension_semantics<parallel>, #tpu.dimension_semantics<parallel>], iteration_bounds = array<i64: 2, 1, 1>, scalar_prefetch = 0 : i64, scratch_operands = 0 : i64, tpu.core_type = #tpu.core_type<tc>, window_params = [{transform_indices = @transform_0, window_bounds = array<i64: 1, 4, 256>}, {transform_indices = @transform_1, window_bounds = array<i64: 1, 4, 256>}, {transform_indices = @transform_2, window_bounds = array<i64: 1, 1, 256>}, {transform_indices = @transform_3, window_bounds = array<i64: 1, 1, 256>}, {transform_indices = @transform_4, window_bounds = array<i64: 1, 256, 1>}, {transform_indices = @transform_5, window_bounds = array<i64: 1, 1, 256>}, {transform_indices = @transform_6, window_bounds = array<i64: 1, 256, 256>}, {transform_indices = @transform_7, window_bounds = array<i64: 1, 256, 256>}]} {
    %c0 = arith.constant 0 : index
    %c0_0 = arith.constant 0 : index
    %c0_1 = arith.constant 0 : index
    %0 = vector.load %arg3[%c0, %c0_0, %c0_1] : memref<1x4x256xf32, #tpu.memory_space<vmem>>, vector<1x4x256xf32>
    %1 = vector.shape_cast %0 : vector<1x4x256xf32> to vector<4x256xf32>
    %c0_2 = arith.constant 0 : index
    %c0_3 = arith.constant 0 : index
    %c0_4 = arith.constant 0 : index
    %2 = vector.load %arg4[%c0_2, %c0_3, %c0_4] : memref<1x4x256xf32, #tpu.memory_space<vmem>>, vector<1x4x256xf32>
    %3 = vector.shape_cast %2 : vector<1x4x256xf32> to vector<4x256xf32>
    %c0_5 = arith.constant 0 : index
    %c0_6 = arith.constant 0 : index
    %c0_7 = arith.constant 0 : index
    %4 = vector.load %arg5[%c0_5, %c0_6, %c0_7] : memref<1x1x256xi32, #tpu.memory_space<vmem>>, vector<1x1x256xi32>
    %5 = vector.shape_cast %4 : vector<1x1x256xi32> to vector<1x256xi32>
    %c0_8 = arith.constant 0 : index
    %c0_9 = arith.constant 0 : index
    %c0_10 = arith.constant 0 : index
    %6 = vector.load %arg6[%c0_8, %c0_9, %c0_10] : memref<1x1x256xi32, #tpu.memory_space<vmem>>, vector<1x1x256xi32>
    %7 = vector.shape_cast %6 : vector<1x1x256xi32> to vector<1x256xi32>
    %8 = tpu.iota {dimensions = array<i32: 0>} : vector<4x256xi32>
    %9 = vector.broadcast %7 : vector<1x256xi32> to vector<4x256xi32>
    %10 = arith.cmpi eq, %8, %9 : vector<4x256xi32>
    %11 = arith.extui %10 : vector<4x256xi1> to vector<4x256xi32>
    %12 = arith.sitofp %11 : vector<4x256xi32> to vector<4x256xf32>
    %13 = tpu.iota {dimensions = array<i32: 0>} : vector<4x256xi32>
    %14 = vector.broadcast %5 : vector<1x256xi32> to vector<4x256xi32>
    %15 = arith.cmpi eq, %13, %14 : vector<4x256xi32>
    %16 = arith.extui %15 : vector<4x256xi1> to vector<4x256xi32>
    %17 = arith.sitofp %16 : vector<4x256xi32> to vector<4x256xf32>
    %cst = arith.constant dense<0.000000e+00> : vector<256x256xf32>
    %18 = tpu.matmul %1, %12, %cst {dimension_numbers = #tpu.dot_dimension_numbers<[0], [0], [1], [1], [0, 1, 1, 1], [], []>} : vector<4x256xf32>, vector<4x256xf32>, vector<256x256xf32> -> vector<256x256xf32>
    %cst_11 = arith.constant dense<0.000000e+00> : vector<256x256xf32>
    %19 = tpu.matmul %17, %3, %cst_11 {dimension_numbers = #tpu.dot_dimension_numbers<[0], [0], [1], [1], [0, 1, 1, 1], [], []>} : vector<4x256xf32>, vector<4x256xf32>, vector<256x256xf32> -> vector<256x256xf32>
    %c0_12 = arith.constant 0 : index
    %c0_13 = arith.constant 0 : index
    %c0_14 = arith.constant 0 : index
    %20 = vector.load %arg7[%c0_12, %c0_13, %c0_14] : memref<1x256x1xf32, #tpu.memory_space<vmem>>, vector<1x256x1xf32>
    %21 = vector.shape_cast %20 : vector<1x256x1xf32> to vector<256x1xf32>
    %c0_15 = arith.constant 0 : index
    %c0_16 = arith.constant 0 : index
    %c0_17 = arith.constant 0 : index
    %22 = vector.load %arg8[%c0_15, %c0_16, %c0_17] : memref<1x1x256xf32, #tpu.memory_space<vmem>>, vector<1x1x256xf32>
    %23 = vector.shape_cast %22 : vector<1x1x256xf32> to vector<1x256xf32>
    %24 = vector.broadcast %21 : vector<256x1xf32> to vector<256x256xf32>
    %25 = vector.broadcast %23 : vector<1x256xf32> to vector<256x256xf32>
    %26 = arith.minimumf %24, %25 : vector<256x256xf32>
    %cst_18 = arith.constant 1.000000e+00 : f32
    %27 = vector.broadcast %cst_18 : f32 to vector<256x256xf32>
    %28 = arith.subf %27, %18 : vector<256x256xf32>
    %29 = arith.mulf %28, %26 : vector<256x256xf32>
    %30 = arith.addf %18, %19 : vector<256x256xf32>
    %cst_19 = arith.constant 5.000000e-01 : f32
    %31 = vector.broadcast %cst_19 : f32 to vector<256x256xf32>
    %32 = arith.mulf %31, %30 : vector<256x256xf32>
    %cst_20 = arith.constant 1.000000e+00 : f32
    %33 = vector.broadcast %cst_20 : f32 to vector<256x256xf32>
    %34 = arith.subf %33, %32 : vector<256x256xf32>
    %35 = arith.mulf %34, %26 : vector<256x256xf32>
    %c0_21 = arith.constant 0 : index
    %c0_22 = arith.constant 0 : index
    %c0_23 = arith.constant 0 : index
    %36 = vector.load %arg9[%c0_21, %c0_22, %c0_23] : memref<1x256x256xf32, #tpu.memory_space<vmem>>, vector<1x256x256xf32>
    %37 = vector.shape_cast %36 : vector<1x256x256xf32> to vector<256x256xf32>
    %38 = vector.shape_cast %29 : vector<256x256xf32> to vector<1x256x256xf32>
    tpu.vector_store %arg9[%c0_21, %c0_22, %c0_23], %38 {strides = array<i32>} : memref<1x256x256xf32, #tpu.memory_space<vmem>>, vector<1x256x256xf32>,
    %c0_24 = arith.constant 0 : index
    %c0_25 = arith.constant 0 : index
    %c0_26 = arith.constant 0 : index
    %39 = vector.load %arg10[%c0_24, %c0_25, %c0_26] : memref<1x256x256xf32, #tpu.memory_space<vmem>>, vector<1x256x256xf32>
    %40 = vector.shape_cast %39 : vector<1x256x256xf32> to vector<256x256xf32>
    %41 = vector.shape_cast %35 : vector<256x256xf32> to vector<1x256x256xf32>
    tpu.vector_store %arg10[%c0_24, %c0_25, %c0_26], %41 {strides = array<i32>} : memref<1x256x256xf32, #tpu.memory_space<vmem>>, vector<1x256x256xf32>,
    return
  }
  func.func @transform_0(%arg0: i32, %arg1: i32, %arg2: i32) -> (i32, i32, i32) {
    %c0_i32 = arith.constant 0 : i32
    %c0_i32_0 = arith.constant 0 : i32
    return %arg0, %c0_i32, %arg1 : i32, i32, i32
  }
  func.func @transform_1(%arg0: i32, %arg1: i32, %arg2: i32) -> (i32, i32, i32) {
    %c0_i32 = arith.constant 0 : i32
    %c0_i32_0 = arith.constant 0 : i32
    return %arg0, %c0_i32, %arg2 : i32, i32, i32
  }
  func.func @transform_2(%arg0: i32, %arg1: i32, %arg2: i32) -> (i32, i32, i32) {
    %c0_i32 = arith.constant 0 : i32
    %c0_i32_0 = arith.constant 0 : i32
    return %arg0, %c0_i32, %arg1 : i32, i32, i32
  }
  func.func @transform_3(%arg0: i32, %arg1: i32, %arg2: i32) -> (i32, i32, i32) {
    %c0_i32 = arith.constant 0 : i32
    %c0_i32_0 = arith.constant 0 : i32
    return %arg0, %c0_i32, %arg2 : i32, i32, i32
  }
  func.func @transform_4(%arg0: i32, %arg1: i32, %arg2: i32) -> (i32, i32, i32) {
    %c0_i32 = arith.constant 0 : i32
    %c0_i32_0 = arith.constant 0 : i32
    return %arg0, %arg1, %c0_i32 : i32, i32, i32
  }
  func.func @transform_5(%arg0: i32, %arg1: i32, %arg2: i32) -> (i32, i32, i32) {
    %c0_i32 = arith.constant 0 : i32
    %c0_i32_0 = arith.constant 0 : i32
    return %arg0, %c0_i32, %arg2 : i32, i32, i32
  }
  func.func @transform_6(%arg0: i32, %arg1: i32, %arg2: i32) -> (i32, i32, i32) {
    %c0_i32 = arith.constant 0 : i32
    return %arg0, %arg1, %arg2 : i32, i32, i32
  }
  func.func @transform_7(%arg0: i32, %arg1: i32, %arg2: i32) -> (i32, i32, i32) {
    %c0_i32 = arith.constant 0 : i32
    return %arg0, %arg1, %arg2 : i32, i32, i32
  }
}

</mosaic_0001>

<bundles_post_ra>
// kernel: sub.12
= control target key start
LH: loop header
LB: loop body
LE: loop exit
PB: predicated region body
PF: predicated region fallthrough
CT: control target
= control target key end

     0   :  { %s8_s6 = smov 3  ;;  %s11_s7 = smov 12  ;;  %vm13_vm0 = vcmask 1043458   ;;  %vm3_vm1 = vcmask 130048   ;;  %vm17_vm2 = vcmask 1048448   ;;  %vm31_vm3 = vcmask 917248   ;;  %s214_s0 = inlined_call_operand.vmem [shape: f32[2,16,16], index: 0, kind: input, shape index: {}]   ;;  %s215_s1 = inlined_call_operand.vmem [shape: f32[2,256], index: 1, kind: output, shape index: {}]  }
   0x1   :  { %v117_v0 = vld [vmem:[%s214_s0 + $0x7] ss:$16 sm:%s8_s6]   ;;  %v118_v1 = vld [vmem:[%s214_s0 - $0x11] ss:$16 sm:%s11_s7]   ;;  %s36_s12 = smov 3  ;;  %s39_s15 = smov 12 }
   0x2   :  { %v14_v2 = vsel %vm13_vm0, %v118_v1, %v117_v0  ;;  %v121_v3 = vld [vmem:[%s214_s0 + $0x5] ss:$16 sm:%s36_s12]   ;;  %s139_s16 = smov 112   ;;  %v122_v4 = vld [vmem:[%s214_s0 - $0x13] ss:$16 sm:%s39_s15]   ;;  %s22_s19 = smov 3 }
   0x3   :  { %15 = vrot.lane.b32.xlu0 %v14_v2, %s139_s16  ;;  %s25_s20 = smov 12  ;;  %v42_v5 = vsel %vm13_vm0, %v122_v4, %v121_v3  ;;  %v119_v6 = vld [vmem:[%s214_s0 + $0x6] ss:$16 sm:%s22_s19]   ;;  %s50_s23 = smov 3  ;;  %vm45_vm4 = vcmask 786048   ;;  %vm59_vm5 = vcmask 654848  }
   0x4   :  { %s140_s24 = smov 80   ;;  %v120_v7 = vld [vmem:[%s214_s0 - $0x12] ss:$16 sm:%s25_s20]   ;;  %s53_s27 = smov 12  ;;  %v123_v8 = vld [vmem:[%s214_s0 + $0x4] ss:$16 sm:%s50_s23]  }
   0x5   :  { %43 = vrot.lane.b32.xlu1 %v42_v5, %s140_s24  ;;  %v124_v9 = vld [vmem:[%s214_s0 - $0x14] ss:$16 sm:%s53_s27]   ;;  %s92_s3 = smov 3  ;;  %s64_s4 = smov 3  ;;  %v28_v10 = vsel %vm13_vm0, %v120_v7, %v119_v6  ;;  %vm73_vm6 = vcmask 523648   ;;  %vm87_vm7 = vcmask 392448  }
   0x6   :  { %v125_v11 = vld [vmem:[%s214_s0 + $0x3] ss:$16 sm:%s64_s4]   ;;  %s67_s7 = smov 12  ;;  %s95_s8 = smov 12  ;;  %v56_v13 = vsel %vm13_vm0, %v124_v9, %v123_v8  ;;  %v129_v15 = vld [vmem:[%s214_s0 + $0x1] ss:$16 sm:%s92_s3]  }
   0x7   :  { %v126_v12 = vld [vmem:[%s214_s0 - $0x15] ss:$16 sm:%s67_s7]   ;;  %s78_s11 = smov 3  ;;  %s81_s12 = smov 12  ;;  %v130_v16 = vld [vmem:[%s214_s0 - $0x17] ss:$16 sm:%s95_s8]  }
   0x8   :  { %v70_v14 = vsel %vm13_vm0, %v126_v12, %v125_v11  ;;  %s141_s13 = smov 96   ;;  %s142_s16 = smov 48   ;;  %v127_v17 = vld [vmem:[%s214_s0 + $0x2] ss:$16 sm:%s78_s11]   ;;  %v128_v18 = vld [vmem:[%s214_s0 - $0x16] ss:$16 sm:%s81_s12]   ;;  %v98_v19 = vsel %vm13_vm0, %v130_v16, %v129_v15 }
   0x9   :  { %71 = vrot.lane.b32.xlu2 %v70_v14, %s142_s16  ;;  %s143_s21 = smov 64   ;;  %v84_v20 = vsel %vm13_vm0, %v128_v18, %v127_v17  ;;  %s144_s24 = smov 16   ;;  %v2_v21 = vld [vmem:[%s214_s0] ss:$8 sm:$0xf]   ;;  %vm101_vm8 = vcmask 261248  }
   0xa   :  { %s145_s25 = smov 32   ;;  %4 = vst.msk [vmem:[#allocation0] ss:$8 sm:$0x3] %vm3_vm1, %v2_v21  }
   0xb   :  { %29 = vrot.lane.b32.xlu0 %v28_v10, %s141_s13  ;;  %6 = vst.msk [vmem:[#allocation0 - $0xf] ss:$8 sm:$0xc] %vm3_vm1, %v2_v21  }
   0xd   :  { %57 = vrot.lane.b32.xlu1 %v56_v13, %s143_s21 }
  0x11   :  { %85 = vrot.lane.b32.xlu2 %v84_v20, %s145_s25 }
  0x13   :  { %99 = vrot.lane.b32.xlu0 %v98_v19, %s144_s24 }
  0x63   :  { %v72_v22 = vpop.permute.xlu2 %71  }
  0x6b   :  { %v86_v23 = vpop.permute.xlu2 %85  }
  0x75   :  { %v16_v24 = vpop.permute.xlu0 %15  }
  0x76   :  { %18 = vst.msk [vmem:[#allocation0] sm:$0x3] %vm17_vm2, %v16_v24  }
  0x77   :  { %20 = vst.msk [vmem:[#allocation0 + $0x6] sm:$0xc] %vm17_vm2, %v16_v24   ;;  %v44_v25 = vpop.permute.xlu1 %43  }
  0x7d   :  { %v30_v26 = vpop.permute.xlu0 %29  }
  0x7e   :  { %32 = vst.msk [vmem:[#allocation0] sm:$0x3] %vm31_vm3, %v30_v26  }
  0x7f   :  { %34 = vst.msk [vmem:[#allocation0 + $0x6] sm:$0xc] %vm31_vm3, %v30_v26   ;;  %v58_v27 = vpop.permute.xlu1 %57  }
  0x80   :  { %46 = vst.msk [vmem:[#allocation0] sm:$0x3] %vm45_vm4, %v44_v25  }
  0x81   :  { %48 = vst.msk [vmem:[#allocation0 + $0x6] sm:$0xc] %vm45_vm4, %v44_v25  }
  0x82   :  { %60 = vst.msk [vmem:[#allocation0] sm:$0x3] %vm59_vm5, %v58_v27  }
  0x83   :  { %62 = vst.msk [vmem:[#allocation0 + $0x6] sm:$0xc] %vm59_vm5, %v58_v27  }
  0x84   :  { %74 = vst.msk [vmem:[#allocation0] sm:$0x3] %vm73_vm6, %v72_v22  }
  0x85   :  { %76 = vst.msk [vmem:[#allocation0 + $0x6] sm:$0xc] %vm73_vm6, %v72_v22   ;;  %v100_v28 = vpop.permute.xlu0 %99  }
  0x86   :  { %88 = vst.msk [vmem:[#allocation0] sm:$0x3] %vm87_vm7, %v86_v23  }
  0x87   :  { %90 = vst.msk [vmem:[#allocation0 + $0x6] sm:$0xc] %vm87_vm7, %v86_v23  }
  0x88   :  { %102 = vst.msk [vmem:[#allocation0] sm:$0x3] %vm101_vm8, %v100_v28  }
  0x89   :  { %104 = vst.msk [vmem:[#allocation0 + $0x6] sm:$0xc] %vm101_vm8, %v100_v28  }
  0x8f   :  { %v107_v29 = vld [vmem:[#allocation0] sm:$0x3] }
  0x90   :  { %110 = vst [vmem:[%s215_s1] sm:$0x3] %v107_v29  ;;  %v112_v30 = vld [vmem:[#allocation0 + $0x8] sm:$0x3] }
  0x91   :  { %131 = vst [vmem:[%s215_s1 + $0x2] sm:$0x3] %v112_v30 }

// kernel: rcb_forward.1
= control target key start
LH: loop header
LB: loop body
LE: loop exit
PB: predicated region body
PF: predicated region fallthrough
CT: control target
= control target key end

     0   :  { %s3529_s0 = inlined_call_operand.vmem [shape: f32[2,4,256], index: 0, kind: input, shape index: {}, may-alias: {0,1}]   ;;  %s3530_s1 = inlined_call_operand.vmem [shape: f32[2,4,256], index: 1, kind: input, shape index: {}, may-alias: {0,1}]   ;;  %s3531_s2 = inlined_call_operand.vmem [shape: s32[2,1,256], index: 2, kind: input, shape index: {}, may-alias: {2,3}]   ;;  %s3532_s3 = inlined_call_operand.vmem [shape: s32[2,1,256], index: 3, kind: input, shape index: {}, may-alias: {2,3}]   ;;  %s3533_s4 = inlined_call_operand.vmem [shape: f32[2,256,1], index: 4, kind: input, shape index: {}]   ;;  %s3534_s5 = inlined_call_operand.vmem [shape: f32[2,1,256], index: 5, kind: input, shape index: {}]   ;;  %s3535_s6 = inlined_call_operand.hbm [shape: f32[2,256,256], index: 6, kind: output, shape index: {0}]   ;;  %s3536_s7 = inlined_call_operand.hbm [shape: f32[2,256,256], index: 7, kind: output, shape index: {1}]  }
   0x1   :  { %3537 = sst [smem:[#allocation8_spill]] %s3529_s0 }
   0x2   :  { %3538 = sst [smem:[#allocation9_spill]] %s3530_s1 }
   0x3   :  { %3539 = sst [smem:[#allocation10_spill]] %s3531_s2 }
   0x4   :  { %13 = vsyncpa [#allocation3], 0 }
   0x5   :  { %15 = vsyncpa [#allocation3 + $0x1], 0 }
   0x6   :  { %16 = vsyncpa [#allocation5], 0 }
   0x7   :  { %18 = vsyncpa [#allocation5 + $0x1], 0  ;;  %s2735_s24 = smov 0   ;;  %s2737_s25 = smov 0  }
   0x8   :  { %s2739_s26 = smov 0   ;;  %s2741_s27 = smov 0  }
   0x9   :  { %s2743_s28 = smov 0   ;;  %s2745_s29 = smov 0  }
   0xa LB: > { %s2347_s30 = sadd.s32 4294967295, %s2689_s29   ;;  %s2348_s8 = sadd.s32 4294967294, %s2689_s29   ;;  %s2689_s29 = sphi %s2745_s29, %s24_s29   ;;  %s2685_s28 = sphi %s2743_s28, %s3549_s28   ;;  %s2681_s27 = sphi %s2741_s27, %s3548_s27   ;;  %s2677_s26 = sphi %s2739_s26, %s3547_s26   ;;  %s2673_s25 = sphi %s2737_s25, %s3546_s25   ;;  %s2669_s24 = sphi %s2735_s24, %s3545_s24  }
   0xb   : > { %s43_s9 = sadd.s32 1, %s2685_s28  ;;  %s222_s10 = sadd.s32 1, %s2677_s26 }
   0xc   : > { %p45_p0 = scmp.ge.s32.totalorder %s43_s9, 2  ;;  %p232_p1 = scmp.ne.s32.totalorder %s2677_s26, %s2673_s25 }
   0xd   : > { %p233_p2 = scmp.eq.s32.totalorder %s2347_s30, 1  ;;  %p238_p3 = scmp.ne.s32.totalorder %s2673_s25, %s2669_s24 }
   0xe   : > { %s3551_s9 = smov (%p45_p0, %s43_s9), 0  ;;  %p239_p5 = scmp.eq.s32.totalorder %s2348_s8, 1 }
   0xf   : > { %p2775_p4 = por %p233_p2, %p232_p1  ;;  %s215_s12 = ssub.s32 %s2685_s28, %s3551_s9 }
  0x10   : > { %p2351_p6 = scmp.ge.s32.totalorder %s2689_s29, 1  ;;  %p220_p7 = scmp.eq.s32.totalorder %s215_s12, 0 }
  0x11   : > { %p2782_p8 = por %p239_p5, %p238_p3  ;;  %p362_p9 = scmp.lt.s32.totalorder %s2689_s29, 3 }
  0x12   : > { %s2788_s14 = scalar_select %p220_p7, %s2677_s26, %s222_s10  }
  0x13   : > { %p363_p10 = pnand %p2351_p6, %p362_p9 }
  0x14   : > { %p446_p11 = scmp.lt.s32.totalorder (!%p363_p10), %s2681_s27, 1  ;;  %s3542_s2 = sld [smem:[#allocation10_spill]] (!%p363_p10) }
  0x15   : > { %366 = sbr.rel (%p363_p10) target bundleno = 724 (0x2d4), region = 44  ;;  %s3543_s0 = sld [smem:[#allocation8_spill]] (!%p363_p10) }
  0x16   : > { %s3544_s1 = sld [smem:[#allocation9_spill]] (!%p363_p10)  ;;  %s2599_s22 = scalar_lea.hbm (!%p363_p10), %s3535_s6, 1024 }
  0x1a   : > { %v510_v0 = vlaneseq  ;;  %v2691_v1 = vmov 0   ;;  %s447_s15 = scalar_select %p446_p11, %s2681_s27, 1  ;;  %v2692_v7 = vmov 0.0   ;;  %vm695_vm1 = vcmask 1043456  }
  0x1b   : > { %2576 = vset.pattern.permute.xlu2 %v2691_v1  ;;  %vm598_vm2 = vcmask 31744  }
  0x1c   : > { %s2793_s16 = sshll.u32 %s447_s15, 1  ;;  %s2509_s17 = sshll.u32 %s447_s15, 8  ;;  %v2804_v2 = vshrl.u32 %v510_v0, 7 }
  0x1d   : > { %s472_s20 = scalar_lea.vmem %s3542_s2, %s2793_s16  ;;  %s2802_s23 = scalar_lea.vmem %s3533_s4, %s2509_s17 }
  0x1e   : > { %v2806_v3 = vld [vmem:[%s472_s20] sm:$0x3]  ;;  %s2507_s30 = sshll.u32 %s447_s15, 3  ;;  %v1323_v9 = vld [vmem:[%s2802_s23 + $0x8] sm:$0xff]  ;;  %v1324_v13 = vld [vmem:[%s2802_s23 + $0x10] sm:$0xff]  ;;  %s481_s21 = scalar_lea.vmem %s3532_s3, %s2793_s16 }
  0x1f   : > { %v1322_v4 = vld [vmem:[%s2802_s23] sm:$0xff]  ;;  %v520_v5 = vperm.slane %v2806_v3, 0  ;;  %s453_s12 = scalar_lea.vmem %s3543_s0, %s2507_s30  ;;  %s463_s18 = scalar_lea.vmem %s3544_s1, %s2507_s30  ;;  %v1325_v14 = vld [vmem:[%s2802_s23 + $0x18] sm:$0xff]  ;;  %v1327_v16 = vld [vmem:[%s2802_s23 + $0x28] sm:$0xff]  ;;  %v521_v34 = vperm.slane %v2806_v3, 1 }
  0x20   : > { %1357 = vperm.xlu2 %2576, %v1322_v4   ;;  %v506_v6 = vld [vmem:[%s453_s12] sm:$0xff]  ;;  %v1328_v17 = vld [vmem:[%s2802_s23 + $0x30] sm:$0xff]  ;;  %v1329_v20 = vld [vmem:[%s2802_s23 + $0x38] sm:$0xff]  ;;  %s500_s8 = scalar_lea.vmem %s3534_s5, %s2793_s16  ;;  %s3010_s16 = sand.u32 1, %s2673_s25  }
  0x21   : > { %vm522_vm0 = vcmp.eq.s32.totalorder %v2804_v2, %v520_v5  ;;  %529 = vst [vmem:[#allocation1] ss:$2 sm:$0xff] %v506_v6  ;;  %v507_v10 = vld [vmem:[%s463_s18] sm:$0xff]  ;;  %v1331_v22 = vld [vmem:[%s2802_s23 + $0x48] sm:$0xff]  ;;  %v1332_v23 = vld [vmem:[%s2802_s23 + $0x50] sm:$0xff]  ;;  %vm523_vm3 = vcmp.eq.s32.totalorder %v2804_v2, %v521_v34  ;;  %s2352_s10 = sshll.u32 %s3010_s16, 9 }
  0x22   : > { %v2365_v8 = vsel %vm522_vm0, 1.0, %v2692_v7  ;;  %v1326_v15 = vld [vmem:[%s2802_s23 + $0x20] sm:$0xff]  ;;  %v1333_v25 = vld [vmem:[%s2802_s23 + $0x58] sm:$0xff]  ;;  %v1335_v29 = vld [vmem:[%s2802_s23 + $0x68] sm:$0xff]  ;;  %v2366_v36 = vsel %vm523_vm3, 1.0, %v2692_v7  ;;  %s3048_s12 = scalar_lea.vmem [#allocation4], %s2352_s10 }
  0x23   : > { %928 = vxpose.xlu0.b32.start.end [1/1] (short) %v2365_v8, 128  ;;  %v1330_v21 = vld [vmem:[%s2802_s23 + $0x40] sm:$0xff]  ;;  %v1336_v31 = vld [vmem:[%s2802_s23 + $0x70] sm:$0xff]  ;;  %v1337_v33 = vld [vmem:[%s2802_s23 + $0x78] sm:$0xff]  ;;  %s2510_s15 = sshll.u32 %s2681_s27, 9  ;;  %s2097_s17 = scalar_lea.sflag [#allocation3], %s3010_s16 }
  0x24   : > { %v1334_v27 = vld [vmem:[%s2802_s23 + $0x60] sm:$0xff]  ;;  %v1341_v39 = vld [vmem:[%s2802_s23 + $0x98] sm:$0xff]  ;;  %v1343_v43 = vld [vmem:[%s2802_s23 + $0xa8] sm:$0xff]  ;;  %s2118_s19 = scalar_lea.hbm %s3535_s6, %s2510_s15  ;;  %s3474_s30 = scalar_lea.hbm %s3536_s7, %s2510_s15 }
  0x25   : > { %v1338_v37 = vld [vmem:[%s2802_s23 + $0x80] sm:$0xff]  ;;  %v1344_v45 = vld [vmem:[%s2802_s23 + $0xb0] sm:$0xff]  ;;  %v1345_v47 = vld [vmem:[%s2802_s23 + $0xb8] sm:$0xff]  ;;  %s2121_s20 = sshll.u32 %s2118_s19, 4  ;;  %s2122_s20 = int_to_ptr.hbm [resolvable:$true] %s2121_s20 }
  0x26   : > { %v1342_v41 = vld [vmem:[%s2802_s23 + $0xa0] sm:$0xff]  ;;  %v1347_v58 = vld [vmem:[%s2802_s23 + $0xc8] sm:$0xff]  ;;  %v1348_v61 = vld [vmem:[%s2802_s23 + $0xd0] sm:$0xff]  ;;  %s2593_s15 = sshra.s32 %s2122_s20, 4  ;;  %s2594_s15 = int_to_ptr.hbm [resolvable:$true] %s2593_s15 }
  0x27   : > { %v509_v50 = vld [vmem:[%s481_s21] sm:$0x3]  ;;  %v1349_v0 = vld [vmem:[%s2802_s23 + $0xd8] sm:$0xff]  ;;  %s2595_s18 = scalar_lea.hbm %s2594_s15, 512  ;;  %p2600_p1 = scmp.lt.s32.totalorder %s2594_s15, %s3535_s6 }
  0x28   : > { %1362 = vperm.xlu2 %2576, %v1323_v9   ;;  %v531_v11 = vld.sshfl [vmem:[#allocation1 + $0x8] sm:$0xff pattern:$0x75316420]  ;;  %v530_v12 = vld.sshfl [vmem:[#allocation1] sm:$0xff pattern:$0x75316420]  ;;  %p2596_p12 = scmp.ne.s32.totalorder %s2594_s15, %s2595_s18  ;;  %p2601_p2 = scmp.lt.s32.totalorder %s2599_s22, %s2595_s18 }
  0x29   : > { %566 = vxpose.xlu1.b32.start.end [1/1] (short) %v531_v11, 128  ;;  %993 = vst [vmem:[#allocation1] ss:$2 sm:$0xff] %v507_v10  ;;  %v1346_v51 = vld [vmem:[%s2802_s23 + $0xc0] sm:$0xff]  ;;  %v512_v52 = vperm.slane %v509_v50, 0  ;;  %v513_v53 = vperm.slane %v509_v50, 1  ;;  %v1352_v10 = vld [vmem:[%s2802_s23 + $0xf0] sm:$0xff] }
  0x2a   : > { %v1350_v4 = vld [vmem:[%s2802_s23 + $0xe0] sm:$0xff]  ;;  %p2597_p13 = pnand %p2596_p12, %p2775_p4  ;;  %p2602_p3 = por %p2601_p2, %p2600_p1 }
  0x2b   : > { %vm514_vm4 = vcmp.eq.s32.totalorder %v2804_v2, %v512_v52  ;;  %vm515_vm5 = vcmp.eq.s32.totalorder %v2804_v2, %v513_v53 }
  0x2c   : > { %v2363_v54 = vsel %vm514_vm4, 1.0, %v2692_v7  ;;  %v2364_v55 = vsel %vm515_vm5, 1.0, %v2692_v7  ;;  %v1351_v7 = vld [vmem:[%s2802_s23 + $0xe8] sm:$0xff]  ;;  %p2598_p0 = pneg %p2597_p13 }
  0x2d   : > { %2367 = vmatpush.msk.msra.mxu0 %vm695_vm1, %v2363_v54  ;;  %2400 = vmatpush.msk.msra.mxu1 %vm695_vm1, %v2364_v55  ;;  %v1339_v54 = vld [vmem:[%s2802_s23 + $0x88] sm:$0xff]  ;;  %v1354_v55 = vld [vmem:[%s500_s8] sm:$0x3]  ;;  %s2141_s8 = sshll.u32 %s3048_s12, 4  ;;  %s2142_s8 = int_to_ptr.vmem [resolvable:$true] %s2141_s8 }
  0x2e   : > { %p2603_p5 = pnand %p2602_p3, %p2598_p0 }
  0x30   : > { %1367 = vperm.xlu2 %2576, %v1324_v13   ;;  %v994_v18 = vld.sshfl [vmem:[#allocation1] sm:$0xff pattern:$0x75316420]  ;;  %v995_v19 = vld.sshfl [vmem:[#allocation1 + $0x8] sm:$0xff pattern:$0x75316420] }
  0x31   : > { %2433 = vmatpush.msk.msra.mxu2 %vm695_vm1, %v994_v18  ;;  %2466 = vmatpush.msk.msra.mxu3 %vm695_vm1, %v995_v19 }
  0x38   : > { %1372 = vperm.xlu2 %2576, %v1325_v14  }
  0x40   : > { %1377 = vperm.xlu2 %2576, %v1326_v15  }
  0x48   : > { %1382 = vperm.xlu2 %2576, %v1327_v16  }
  0x50   : > { %1387 = vperm.xlu2 %2576, %v1328_v17  }
  0x58   : > { %1392 = vperm.xlu2 %2576, %v1329_v20  }
  0x60   : > { %1397 = vperm.xlu2 %2576, %v1330_v21  }
  0x68   : > { %1402 = vperm.xlu2 %2576, %v1331_v22  }
  0x70   : > { %1407 = vperm.xlu2 %2576, %v1332_v23  }
  0x78   : > { %1412 = vperm.xlu2 %2576, %v1333_v25  }
  0x80   : > { %1417 = vperm.xlu2 %2576, %v1334_v27  }
  0x88   : > { %1422 = vperm.xlu2 %2576, %v1335_v29  }
  0x90   : > { %1427 = vperm.xlu2 %2576, %v1336_v31   ;;  %v1358_v31 = vpop.permute.xlu2 %1357 }
  0x98   : > { %1432 = vperm.xlu2 %2576, %v1337_v33  }
  0xa0   : > { %1437 = vperm.xlu2 %2576, %v1338_v37   ;;  %v2962_v37 = vpop.permute.xlu2 %1362 }
  0xa3   : > { %534 = vxpose.xlu0.b32.start.end [1/1] (short) %v530_v12, 128  ;;  %v1353_v12 = vld [vmem:[%s2802_s23 + $0xf8] sm:$0xff] }
  0xa8   : > { %1452 = vperm.xlu2 %2576, %v1341_v39  }
  0xa9   : > { %960 = vxpose.xlu1.b32.start.end [1/1] (short) %v2366_v36, 128 }
  0xb0   : > { %1457 = vperm.xlu2 %2576, %v1342_v41  }
  0xb8   : > { %1462 = vperm.xlu2 %2576, %v1343_v43  }
  0xc0   : > { %1467 = vperm.xlu2 %2576, %v1344_v45  }
  0xc7   : > { %v944_v24 = vpop.trf.xlu0 }
  0xc8   : > { %2434 = vmatmul.msk.f32.vlgmr.msra.gmra.mxu2 %vm598_vm2, %v944_v24  ;;  %2467 = vmatmul.msk.f32.vlgmr.msra.gmra.mxu3 %vm598_vm2, %v944_v24 }
  0xc9   : > { %1472 = vperm.xlu2 %2576, %v1345_v47  }
  0xcd   : > { %v2873_v49 = vpop.trf.xlu1 }
  0xcf   : > { %v945_v26 = vpop.trf.xlu0 }
  0xd0   : > { %2435 = vmatmul.msk.f32.gmra.mxu2 %vm598_vm2, %v945_v26  ;;  %2468 = vmatmul.msk.f32.gmra.mxu3 %vm598_vm2, %v945_v26 }
  0xd1   : > { %1477 = vperm.xlu2 %2576, %v1346_v51  }
  0xd5   : > { %v2884_v57 = vpop.trf.xlu1 }
  0xd7   : > { %v946_v28 = vpop.trf.xlu0 }
  0xd8   : > { %2436 = vmatmul.msk.f32.gmra.mxu2 %vm598_vm2, %v946_v28  ;;  %2469 = vmatmul.msk.f32.gmra.mxu3 %vm598_vm2, %v946_v28 }
  0xd9   : > { %1482 = vperm.xlu2 %2576, %v1347_v58  }
  0xdd   : > { %v2889_v60 = vpop.trf.xlu1 }
  0xdf   : > { %v947_v30 = vpop.trf.xlu0 }
  0xe0   : > { %2437 = vmatmul.msk.f32.gmra.mxu2 %vm598_vm2, %v947_v30  ;;  %2470 = vmatmul.msk.f32.gmra.mxu3 %vm598_vm2, %v947_v30 }
  0xe1   : > { %1487 = vperm.xlu2 %2576, %v1348_v61   ;;  %v3005_v61 = vperm.slane %v1354_v55, 1 }
  0xe5   : > { %v2894_v63 = vpop.trf.xlu1 }
  0xe7   : > { %v948_v32 = vpop.trf.xlu0 }
  0xe8   : > { %2438 = vmatmul.msk.f32.gmra.mxu2 %vm598_vm2, %v948_v32  ;;  %2471 = vmatmul.msk.f32.gmra.mxu3 %vm598_vm2, %v948_v32 }
  0xe9   : > { %1492 = vperm.xlu2 %2576, %v1349_v0  }
  0xed   : > { %v2899_v3 = vpop.trf.xlu1 }
  0xef   : > { %v949_v35 = vpop.trf.xlu0 }
  0xf0   : > { %2439 = vmatmul.msk.f32.gmra.mxu2 %vm598_vm2, %v949_v35  ;;  %2472 = vmatmul.msk.f32.gmra.mxu3 %vm598_vm2, %v949_v35 }
  0xf1   : > { %1497 = vperm.xlu2 %2576, %v1350_v4  }
  0xf5   : > { %v2905_v6 = vpop.trf.xlu1 }
  0xf7   : > { %v950_v38 = vpop.trf.xlu0 }
  0xf8   : > { %2440 = vmatmul.msk.f32.gmra.mxu2 %vm598_vm2, %v950_v38  ;;  %2473 = vmatmul.msk.f32.gmra.mxu3 %vm598_vm2, %v950_v38 }
  0xf9   : > { %1502 = vperm.xlu2 %2576, %v1351_v7  }
  0xfc   : > { %2578 = vset.pattern.permute.xlu1 %v2691_v1 }
  0xfd   : > { %v2910_v9 = vpop.trf.xlu1 }
  0xff   : > { %v951_v40 = vpop.trf.xlu0 }
 0x100   : > { %2441 = vmatmul.msk.f32.gmra.mxu2 %vm598_vm2, %v951_v40  ;;  %2474 = vmatmul.msk.f32.gmra.mxu3 %vm598_vm2, %v951_v40 }
 0x101   : > { %1507 = vperm.xlu2 %2576, %v1352_v10  }
 0x105   : > { %v2915_v11 = vpop.trf.xlu1 }
 0x107   : > { %v952_v42 = vpop.trf.xlu0 }
 0x108   : > { %2442 = vmatmul.msk.f32.gmra.mxu2 %vm598_vm2, %v952_v42  ;;  %2475 = vmatmul.msk.f32.gmra.mxu3 %vm598_vm2, %v952_v42  ;;  %v2974_v42 = vpop.permute.xlu2 %1367 }
 0x109   : > { %1512 = vperm.xlu2 %2576, %v1353_v12  }
 0x10a   : > { %2577 = vset.pattern.permute.xlu0 %v2691_v1 }
 0x10d   : > { %v2920_v14 = vpop.trf.xlu1 }
 0x10f   : > { %v953_v44 = vpop.trf.xlu0 }
 0x110   : > { %2443 = vmatmul.msk.f32.gmra.mxu2 %vm598_vm2, %v953_v44  ;;  %2476 = vmatmul.msk.f32.gmra.mxu3 %vm598_vm2, %v953_v44 }
 0x115   : > { %v2924_v16 = vpop.trf.xlu1 }
 0x117   : > { %v954_v46 = vpop.trf.xlu0 }
 0x118   : > { %2444 = vmatmul.msk.f32.gmra.mxu2 %vm598_vm2, %v954_v46  ;;  %2477 = vmatmul.msk.f32.gmra.mxu3 %vm598_vm2, %v954_v46 }
 0x11d   : > { %v2928_v18 = vpop.trf.xlu1 }
 0x11f   : > { %v955_v48 = vpop.trf.xlu0 }
 0x120   : > { %2445 = vmatmul.msk.f32.gmra.mxu2 %vm598_vm2, %v955_v48  ;;  %2478 = vmatmul.msk.f32.gmra.mxu3 %vm598_vm2, %v955_v48  ;;  %v2986_v48 = vpop.permute.xlu2 %1372 }
 0x125   : > { %v2932_v20 = vpop.trf.xlu1 }
 0x127   : > { %v956_v56 = vpop.trf.xlu0 }
 0x128   : > { %2446 = vmatmul.msk.f32.gmra.mxu2 %vm598_vm2, %v956_v56  ;;  %2479 = vmatmul.msk.f32.gmra.mxu3 %vm598_vm2, %v956_v56  ;;  %v3001_v56 = vpop.permute.xlu2 %1377 }
 0x12d   : > { %v2936_v22 = vpop.trf.xlu1 }
 0x12f   : > { %v957_v59 = vpop.trf.xlu0 }
 0x130   : > { %2447 = vmatmul.msk.f32.gmra.mxu2 %vm598_vm2, %v957_v59  ;;  %2480 = vmatmul.msk.f32.gmra.mxu3 %vm598_vm2, %v957_v59  ;;  %v3003_v59 = vperm.slane %v1354_v55, 0 }
 0x132   : > { %v1520_v4 = vmin.f32 %v1358_v31, %v3003_v59 }
 0x135   : > { %v2944_v26 = vpop.trf.xlu1 }
 0x137   : > { %v958_v62 = vpop.trf.xlu0 }
 0x138   : > { %2448 = vmatmul.msk.f32.gmra.mxu2 %vm598_vm2, %v958_v62  ;;  %2481 = vmatmul.msk.f32.gmra.mxu3 %vm598_vm2, %v958_v62 }
 0x13d   : > { %v2950_v29 = vpop.trf.xlu1 }
 0x13f   : > { %v959_v2 = vpop.trf.xlu0 }
 0x140   : > { %2449 = vmatmul.msk.f32.gmra.mxu2 %vm598_vm2, %v959_v2  ;;  %2482 = vmatmul.msk.f32.gmra.mxu3 %vm598_vm2, %v959_v2  ;;  %v1340_v2 = vld [vmem:[%s2802_s23 + $0x90] sm:$0xff]  ;;  %s3032_s23 = scalar_lea.vmem [#allocation2], %s2352_s10  ;;  %s2143_s10 = sshll.u32 %s3474_s30, 4  ;;  %s2144_s10 = int_to_ptr.hbm [resolvable:$true] %s2143_s10 }
 0x141   : > { %s2119_s27 = sshll.u32 %s3032_s23, 4  ;;  %s3476_s27 = int_to_ptr.vmem [resolvable:$true] %s2119_s27 }
 0x145   : > { %v2956_v33 = vpop.trf.xlu1 }
 0x147   : > { %v550_v5 = vpop.trf.xlu0 }
 0x148   : > { %2368 = vmatmul.msk.f32.vlgmr.msra.gmra.mxu0 %vm598_vm2, %v550_v5  ;;  %2401 = vmatmul.msk.f32.vlgmr.msra.gmra.mxu1 %vm598_vm2, %v550_v5  ;;  %v1521_v5 = vmin.f32 %v1358_v31, %v3005_v61 }
 0x14b   : > { %v2938_v23 = vpop.f32.mrf.mxu2  ;;  %v2940_v25 = vpop.f32.mrf.mxu3 }
 0x14d   : > { %v976_v38 = vpop.trf.xlu1 }
 0x14e   : > { %2450 = vmatmul.msk.f32.gmra.mxu2 %vm598_vm2, %v976_v38  ;;  %2483 = vmatmul.msk.f32.gmra.mxu3 %vm598_vm2, %v976_v38 }
 0x14f   : > { %v551_v8 = vpop.trf.xlu0 }
 0x150   : > { %2369 = vmatmul.msk.f32.gmra.mxu0 %vm598_vm2, %v551_v8  ;;  %2402 = vmatmul.msk.f32.gmra.mxu1 %vm598_vm2, %v551_v8 }
 0x153   : > { %v2946_v28 = vpop.f32.mrf.mxu2  ;;  %v2952_v30 = vpop.f32.mrf.mxu3 }
 0x155   : > { %v977_v43 = vpop.trf.xlu1 }
 0x156   : > { %2451 = vmatmul.msk.f32.gmra.mxu2 %vm598_vm2, %v977_v43  ;;  %2484 = vmatmul.msk.f32.gmra.mxu3 %vm598_vm2, %v977_v43 }
 0x157   : > { %v552_v1 = vpop.trf.xlu0 }
 0x158   : > { %2370 = vmatmul.msk.f32.gmra.mxu0 %vm598_vm2, %v552_v1  ;;  %2403 = vmatmul.msk.f32.gmra.mxu1 %vm598_vm2, %v552_v1 }
 0x15b   : > { %v2958_v34 = vpop.f32.mrf.mxu2  ;;  %v2960_v35 = vpop.f32.mrf.mxu3 }
 0x15d   : > { %v978_v47 = vpop.trf.xlu1 }
 0x15e   : > { %2452 = vmatmul.msk.f32.gmra.mxu2 %vm598_vm2, %v978_v47  ;;  %2485 = vmatmul.msk.f32.gmra.mxu3 %vm598_vm2, %v978_v47 }
 0x15f   : > { %v553_v13 = vpop.trf.xlu0 }
 0x160   : > { %2371 = vmatmul.msk.f32.gmra.mxu0 %vm598_vm2, %v553_v13  ;;  %2404 = vmatmul.msk.f32.gmra.mxu1 %vm598_vm2, %v553_v13 }
 0x163   : > { %v2968_v39 = vpop.f32.mrf.mxu2  ;;  %v2970_v40 = vpop.f32.mrf.mxu3 }
 0x165   : > { %v979_v53 = vpop.trf.xlu1 }
 0x166   : > { %2453 = vmatmul.msk.f32.gmra.mxu2 %vm598_vm2, %v979_v53  ;;  %2486 = vmatmul.msk.f32.gmra.mxu3 %vm598_vm2, %v979_v53 }
 0x167   : > { %v554_v15 = vpop.trf.xlu0 }
 0x168   : > { %2372 = vmatmul.msk.f32.gmra.mxu0 %vm598_vm2, %v554_v15  ;;  %2405 = vmatmul.msk.f32.gmra.mxu1 %vm598_vm2, %v554_v15 }
 0x16b   : > { %v2978_v44 = vpop.f32.mrf.mxu2  ;;  %v2980_v46 = vpop.f32.mrf.mxu3 }
 0x16d   : > { %v980_v0 = vpop.trf.xlu1 }
 0x16e   : > { %2454 = vmatmul.msk.f32.gmra.mxu2 %vm598_vm2, %v980_v0  ;;  %2487 = vmatmul.msk.f32.gmra.mxu3 %vm598_vm2, %v980_v0 }
 0x16f   : > { %v555_v17 = vpop.trf.xlu0 }
 0x170   : > { %2373 = vmatmul.msk.f32.gmra.mxu0 %vm598_vm2, %v555_v17  ;;  %2406 = vmatmul.msk.f32.gmra.mxu1 %vm598_vm2, %v555_v17  ;;  %v3024_v17 = vpop.permute.xlu2 %1382 }
 0x173   : > { %v2988_v51 = vpop.f32.mrf.mxu2  ;;  %v2996_v52 = vpop.f32.mrf.mxu3 }
 0x177   : > { %v556_v19 = vpop.trf.xlu0 }
 0x178   : > { %2374 = vmatmul.msk.f32.gmra.mxu0 %vm598_vm2, %v556_v19  ;;  %2407 = vmatmul.msk.f32.gmra.mxu1 %vm598_vm2, %v556_v19 }
 0x17b   : > { %v3012_v62 = vpop.f32.mrf.mxu2  ;;  %v3019_v7 = vpop.f32.mrf.mxu3  ;;  %1447 = vperm.xlu1 %2578, %v1340_v2  }
 0x17f   : > { %v557_v21 = vpop.trf.xlu0 }
 0x180   : > { %2375 = vmatmul.msk.f32.gmra.mxu0 %vm598_vm2, %v557_v21  ;;  %2408 = vmatmul.msk.f32.gmra.mxu1 %vm598_vm2, %v557_v21 }
 0x183   : > { %v3044_v47 = vpop.f32.mrf.mxu3 }
 0x187   : > { %v558_v24 = vpop.trf.xlu0 }
 0x188   : > { %2376 = vmatmul.msk.f32.gmra.mxu0 %vm598_vm2, %v558_v24  ;;  %2409 = vmatmul.msk.f32.gmra.mxu1 %vm598_vm2, %v558_v24 }
 0x189   : > { %1442 = vperm.xlu0 %2577, %v1339_v54  }
 0x18f   : > { %v559_v27 = vpop.trf.xlu0 }
 0x190   : > { %2377 = vmatmul.msk.f32.gmra.mxu0 %vm598_vm2, %v559_v27  ;;  %2410 = vmatmul.msk.f32.gmra.mxu1 %vm598_vm2, %v559_v27 }
 0x197   : > { %v560_v32 = vpop.trf.xlu0 }
 0x198   : > { %2378 = vmatmul.msk.f32.gmra.mxu0 %vm598_vm2, %v560_v32  ;;  %2411 = vmatmul.msk.f32.gmra.mxu1 %vm598_vm2, %v560_v32  ;;  %v1522_v32 = vmin.f32 %v2962_v37, %v3003_v59 }
 0x19f   : > { %v561_v36 = vpop.trf.xlu0 }
 0x1a0   : > { %2379 = vmatmul.msk.f32.gmra.mxu0 %vm598_vm2, %v561_v36  ;;  %2412 = vmatmul.msk.f32.gmra.mxu1 %vm598_vm2, %v561_v36  ;;  %v3042_v36 = vpop.f32.mrf.mxu2 }
 0x1a7   : > { %v562_v41 = vpop.trf.xlu0 }
 0x1a8   : > { %2380 = vmatmul.msk.f32.gmra.mxu0 %vm598_vm2, %v562_v41  ;;  %2413 = vmatmul.msk.f32.gmra.mxu1 %vm598_vm2, %v562_v41 }
 0x1af   : > { %v563_v45 = vpop.trf.xlu0 }
 0x1b0   : > { %2381 = vmatmul.msk.f32.gmra.mxu0 %vm598_vm2, %v563_v45  ;;  %2414 = vmatmul.msk.f32.gmra.mxu1 %vm598_vm2, %v563_v45 }
 0x1b7   : > { %v564_v50 = vpop.trf.xlu0 }
 0x1b8   : > { %2382 = vmatmul.msk.f32.gmra.mxu0 %vm598_vm2, %v564_v50  ;;  %2415 = vmatmul.msk.f32.gmra.mxu1 %vm598_vm2, %v564_v50 }
 0x1bf   : > { %v565_v58 = vpop.trf.xlu0 }
 0x1c0   : > { %2383 = vmatmul.msk.f32.gmra.mxu0 %vm598_vm2, %v565_v58  ;;  %2416 = vmatmul.msk.f32.gmra.mxu1 %vm598_vm2, %v565_v58 }
 0x1c5   : > { %v719_v8 = vpop.f32.mrf.mxu0  ;;  %v832_v10 = vpop.f32.mrf.mxu1 }
 0x1c6   : > { %v1584_v1 = vsub.f32 1.0, %v719_v8  ;;  %v1712_v12 = vadd.f32 %v2938_v23, %v719_v8  ;;  %v1585_v13 = vsub.f32 1.0, %v832_v10  ;;  %v1713_v15 = vadd.f32 %v2940_v25, %v832_v10  ;;  %v981_v25 = vpop.trf.xlu1 }
 0x1c7   : > { %2455 = vmatmul.msk.f32.gmra.mxu2 %vm598_vm2, %v981_v25  ;;  %2488 = vmatmul.msk.f32.gmra.mxu3 %vm598_vm2, %v981_v25  ;;  %v1525_v10 = vmin.f32 %v2974_v42, %v3005_v61 }
 0x1c8   : > { %v1648_v19 = vmul.f32 %v1584_v1, %v1520_v4  ;;  %v1776_v21 = vmul.f32 0.5, %v1712_v12  ;;  %v1649_v24 = vmul.f32 %v1585_v13, %v1521_v5  ;;  %v1777_v27 = vmul.f32 0.5, %v1713_v15  ;;  %2384 = vmatmul.msk.f32.gmra.mxu0 %vm598_vm2, %v2873_v49  ;;  %2417 = vmatmul.msk.f32.gmra.mxu1 %vm598_vm2, %v2873_v49  ;;  %v3068_v15 = vpop.f32.mrf.mxu2 }
 0x1c9   : > { %v1523_v49 = vmin.f32 %v2962_v37, %v3005_v61 }
 0x1ca   : > { %v1840_v31 = vsub.f32 1.0, %v1776_v21  ;;  %1968 = vst [vmem:[%s3032_s23] sm:$0xff] %v1648_v19  ;;  %v1841_v23 = vsub.f32 1.0, %v1777_v27 }
 0x1cb   : > { %1969 = vst [vmem:[%s3032_s23 + $0x8] sm:$0xff] %v1649_v24 }
 0x1cc   : > { %v1904_v38 = vmul.f32 %v1840_v31, %v1520_v4  ;;  %v1905_v41 = vmul.f32 %v1841_v23, %v1521_v5  ;;  %v3058_v4 = vpop.permute.xlu2 %1387  ;;  %v3074_v31 = vpop.f32.mrf.mxu3 }
 0x1cd   : > { %v722_v43 = vpop.f32.mrf.mxu0  ;;  %v835_v45 = vpop.f32.mrf.mxu1 }
 0x1ce   : > { %2032 = vst [vmem:[%s3048_s12] sm:$0xff] %v1904_v38  ;;  %v1586_v50 = vsub.f32 1.0, %v722_v43  ;;  %v1714_v53 = vadd.f32 %v2946_v28, %v722_v43  ;;  %v1587_v37 = vsub.f32 1.0, %v835_v45  ;;  %v1715_v54 = vadd.f32 %v2952_v30, %v835_v45  ;;  %v982_v8 = vpop.trf.xlu1 }
 0x1cf   : > { %2033 = vst [vmem:[%s3048_s12 + $0x8] sm:$0xff] %v1905_v41  ;;  %2456 = vmatmul.msk.f32.gmra.mxu2 %vm598_vm2, %v982_v8  ;;  %2489 = vmatmul.msk.f32.gmra.mxu3 %vm598_vm2, %v982_v8  ;;  %v1524_v30 = vmin.f32 %v2974_v42, %v3003_v59  ;;  %v1526_v45 = vmin.f32 %v2986_v48, %v3003_v59 }
 0x1d0   : > { %v1650_v55 = vmul.f32 %v1586_v50, %v1522_v32  ;;  %v1778_v58 = vmul.f32 0.5, %v1714_v53  ;;  %v1651_v0 = vmul.f32 %v1587_v37, %v1523_v49  ;;  %v1779_v2 = vmul.f32 0.5, %v1715_v54  ;;  %2385 = vmatmul.msk.f32.gmra.mxu0 %vm598_vm2, %v2884_v57  ;;  %2418 = vmatmul.msk.f32.gmra.mxu1 %vm598_vm2, %v2884_v57 }
 0x1d2   : > { %v1842_v5 = vsub.f32 1.0, %v1778_v58  ;;  %1970 = vst [vmem:[%s3032_s23 + $0x10] sm:$0xff] %v1650_v55  ;;  %v1843_v28 = vsub.f32 1.0, %v1779_v2 }
 0x1d3   : > { %1971 = vst [vmem:[%s3032_s23 + $0x18] sm:$0xff] %v1651_v0  ;;  %v3094_v0 = vpop.f32.mrf.mxu2 }
 0x1d4   : > { %v1906_v57 = vmul.f32 %v1842_v5, %v1522_v32  ;;  %v1907_v1 = vmul.f32 %v1843_v28, %v1523_v49 }
 0x1d5   : > { %v725_v12 = vpop.f32.mrf.mxu0  ;;  %v838_v13 = vpop.f32.mrf.mxu1 }
 0x1d6   : > { %2034 = vst [vmem:[%s3048_s12 + $0x10] sm:$0xff] %v1906_v57  ;;  %v1588_v19 = vsub.f32 1.0, %v725_v12  ;;  %v1716_v21 = vadd.f32 %v2958_v34, %v725_v12  ;;  %v1589_v24 = vsub.f32 1.0, %v838_v13  ;;  %v1717_v27 = vadd.f32 %v2960_v35, %v838_v13  ;;  %v983_v38 = vpop.trf.xlu1  ;;  %v3084_v35 = vpop.permute.xlu2 %1392 }
 0x1d7   : > { %2035 = vst [vmem:[%s3048_s12 + $0x18] sm:$0xff] %v1907_v1  ;;  %2457 = vmatmul.msk.f32.gmra.mxu2 %vm598_vm2, %v983_v38  ;;  %2490 = vmatmul.msk.f32.gmra.mxu3 %vm598_vm2, %v983_v38  ;;  %v1528_v1 = vmin.f32 %v3001_v56, %v3003_v59 }
 0x1d8   : > { %v1652_v23 = vmul.f32 %v1588_v19, %v1524_v30  ;;  %v1780_v42 = vmul.f32 0.5, %v1716_v21  ;;  %v1653_v25 = vmul.f32 %v1589_v24, %v1525_v10  ;;  %v1781_v32 = vmul.f32 0.5, %v1717_v27  ;;  %2386 = vmatmul.msk.f32.gmra.mxu0 %vm598_vm2, %v2889_v60  ;;  %2419 = vmatmul.msk.f32.gmra.mxu1 %vm598_vm2, %v2889_v60 }
 0x1d9   : > { %v1527_v60 = vmin.f32 %v2986_v48, %v3005_v61  ;;  %v3100_v48 = vpop.f32.mrf.mxu3 }
 0x1da   : > { %v1844_v49 = vsub.f32 1.0, %v1780_v42  ;;  %1972 = vst [vmem:[%s3032_s23 + $0x20] sm:$0xff] %v1652_v23  ;;  %v1845_v34 = vsub.f32 1.0, %v1781_v32 }
 0x1db   : > { %1973 = vst [vmem:[%s3032_s23 + $0x28] sm:$0xff] %v1653_v25 }
 0x1dc   : > { %v1908_v41 = vmul.f32 %v1844_v49, %v1524_v30  ;;  %v1909_v43 = vmul.f32 %v1845_v34, %v1525_v10 }
 0x1dd   : > { %v728_v50 = vpop.f32.mrf.mxu0  ;;  %v841_v53 = vpop.f32.mrf.mxu1 }
 0x1de   : > { %2036 = vst [vmem:[%s3048_s12 + $0x20] sm:$0xff] %v1908_v41  ;;  %v1590_v37 = vsub.f32 1.0, %v728_v50  ;;  %v1718_v54 = vadd.f32 %v2968_v39, %v728_v50  ;;  %v1591_v55 = vsub.f32 1.0, %v841_v53  ;;  %v1719_v58 = vadd.f32 %v2970_v40, %v841_v53  ;;  %v984_v40 = vpop.trf.xlu1  ;;  %v3110_v19 = vpop.permute.xlu2 %1397 }
 0x1df   : > { %2037 = vst [vmem:[%s3048_s12 + $0x28] sm:$0xff] %v1909_v43  ;;  %2458 = vmatmul.msk.f32.gmra.mxu2 %vm598_vm2, %v984_v40  ;;  %2491 = vmatmul.msk.f32.gmra.mxu3 %vm598_vm2, %v984_v40 }
 0x1e0   : > { %v1654_v2 = vmul.f32 %v1590_v37, %v1526_v45  ;;  %v1782_v5 = vmul.f32 0.5, %v1718_v54  ;;  %v1655_v28 = vmul.f32 %v1591_v55, %v1527_v60  ;;  %v1783_v8 = vmul.f32 0.5, %v1719_v58  ;;  %2387 = vmatmul.msk.f32.gmra.mxu0 %vm598_vm2, %v2894_v63  ;;  %2420 = vmatmul.msk.f32.gmra.mxu1 %vm598_vm2, %v2894_v63 }
 0x1e1   : > { %v1529_v63 = vmin.f32 %v3001_v56, %v3005_v61  ;;  %v3120_v56 = vpop.f32.mrf.mxu2 }
 0x1e2   : > { %v1846_v39 = vsub.f32 1.0, %v1782_v5  ;;  %1974 = vst [vmem:[%s3032_s23 + $0x30] sm:$0xff] %v1654_v2  ;;  %v1847_v30 = vsub.f32 1.0, %v1783_v8 }
 0x1e3   : > { %1975 = vst [vmem:[%s3032_s23 + $0x38] sm:$0xff] %v1655_v28 }
 0x1e4   : > { %v1910_v10 = vmul.f32 %v1846_v39, %v1526_v45  ;;  %v1911_v57 = vmul.f32 %v1847_v30, %v1527_v60  ;;  %v1531_v45 = vmin.f32 %v3024_v17, %v3005_v61 }
 0x1e5   : > { %v731_v12 = vpop.f32.mrf.mxu0  ;;  %v844_v13 = vpop.f32.mrf.mxu1 }
 0x1e6   : > { %2038 = vst [vmem:[%s3048_s12 + $0x30] sm:$0xff] %v1910_v10  ;;  %v1592_v21 = vsub.f32 1.0, %v731_v12  ;;  %v1720_v24 = vadd.f32 %v2978_v44, %v731_v12  ;;  %v1593_v27 = vsub.f32 1.0, %v844_v13  ;;  %v1721_v23 = vadd.f32 %v2980_v46, %v844_v13  ;;  %v985_v38 = vpop.trf.xlu1  ;;  %v3126_v46 = vpop.f32.mrf.mxu3 }
 0x1e7   : > { %2039 = vst [vmem:[%s3048_s12 + $0x38] sm:$0xff] %v1911_v57  ;;  %2459 = vmatmul.msk.f32.gmra.mxu2 %vm598_vm2, %v985_v38  ;;  %2492 = vmatmul.msk.f32.gmra.mxu3 %vm598_vm2, %v985_v38  ;;  %v3136_v58 = vpop.permute.xlu2 %1402  ;;  %v1532_v10 = vmin.f32 %v3058_v4, %v3003_v59 }
 0x1e8   : > { %v1656_v42 = vmul.f32 %v1592_v21, %v1528_v1  ;;  %v1784_v25 = vmul.f32 0.5, %v1720_v24  ;;  %v1657_v32 = vmul.f32 %v1593_v27, %v1529_v63  ;;  %v1785_v49 = vmul.f32 0.5, %v1721_v23  ;;  %2388 = vmatmul.msk.f32.gmra.mxu0 %vm598_vm2, %v2899_v3  ;;  %2421 = vmatmul.msk.f32.gmra.mxu1 %vm598_vm2, %v2899_v3 }
 0x1e9   : > { %v1530_v3 = vmin.f32 %v3024_v17, %v3003_v59 }
 0x1ea   : > { %v1848_v34 = vsub.f32 1.0, %v1784_v25  ;;  %1976 = vst [vmem:[%s3032_s23 + $0x40] sm:$0xff] %v1656_v42  ;;  %v1849_v44 = vsub.f32 1.0, %v1785_v49 }
 0x1eb   : > { %1977 = vst [vmem:[%s3032_s23 + $0x48] sm:$0xff] %v1657_v32 }
 0x1ec   : > { %v1912_v41 = vmul.f32 %v1848_v34, %v1528_v1  ;;  %v1913_v43 = vmul.f32 %v1849_v44, %v1529_v63  ;;  %v1534_v44 = vmin.f32 %v3084_v35, %v3003_v59 }
 0x1ed   : > { %v734_v60 = vpop.f32.mrf.mxu0  ;;  %v847_v50 = vpop.f32.mrf.mxu1 }
 0x1ee   : > { %2040 = vst [vmem:[%s3048_s12 + $0x40] sm:$0xff] %v1912_v41  ;;  %v1594_v53 = vsub.f32 1.0, %v734_v60  ;;  %v1722_v37 = vadd.f32 %v2988_v51, %v734_v60  ;;  %v1595_v54 = vsub.f32 1.0, %v847_v50  ;;  %v1723_v55 = vadd.f32 %v2996_v52, %v847_v50  ;;  %v986_v39 = vpop.trf.xlu1  ;;  %v3146_v52 = vpop.f32.mrf.mxu2 }
 0x1ef   : > { %2041 = vst [vmem:[%s3048_s12 + $0x48] sm:$0xff] %v1913_v43  ;;  %2460 = vmatmul.msk.f32.gmra.mxu2 %vm598_vm2, %v986_v39  ;;  %2493 = vmatmul.msk.f32.gmra.mxu3 %vm598_vm2, %v986_v39  ;;  %v3152_v63 = vpop.f32.mrf.mxu3 }
 0x1f0   : > { %v1658_v2 = vmul.f32 %v1594_v53, %v1530_v3  ;;  %v1786_v5 = vmul.f32 0.5, %v1722_v37  ;;  %v1659_v28 = vmul.f32 %v1595_v54, %v1531_v45  ;;  %v1787_v8 = vmul.f32 0.5, %v1723_v55  ;;  %2389 = vmatmul.msk.f32.gmra.mxu0 %vm598_vm2, %v2905_v6  ;;  %2422 = vmatmul.msk.f32.gmra.mxu1 %vm598_vm2, %v2905_v6 }
 0x1f1   : > { %v1533_v6 = vmin.f32 %v3058_v4, %v3005_v61  ;;  %v3162_v4 = vpop.permute.xlu2 %1407 }
 0x1f2   : > { %v1850_v17 = vsub.f32 1.0, %v1786_v5  ;;  %1978 = vst [vmem:[%s3032_s23 + $0x50] sm:$0xff] %v1658_v2  ;;  %v1851_v51 = vsub.f32 1.0, %v1787_v8 }
 0x1f3   : > { %1979 = vst [vmem:[%s3032_s23 + $0x58] sm:$0xff] %v1659_v28 }
 0x1f4   : > { %v1914_v30 = vmul.f32 %v1850_v17, %v1530_v3  ;;  %v1915_v40 = vmul.f32 %v1851_v51, %v1531_v45  ;;  %v1536_v17 = vmin.f32 %v3110_v19, %v3003_v59 }
 0x1f5   : > { %v737_v57 = vpop.f32.mrf.mxu0  ;;  %v850_v1 = vpop.f32.mrf.mxu1 }
 0x1f6   : > { %2042 = vst [vmem:[%s3048_s12 + $0x50] sm:$0xff] %v1914_v30  ;;  %v1596_v12 = vsub.f32 1.0, %v737_v57  ;;  %v1724_v13 = vadd.f32 %v3012_v62, %v737_v57  ;;  %v1597_v21 = vsub.f32 1.0, %v850_v1  ;;  %v1725_v24 = vadd.f32 %v3019_v7, %v850_v1  ;;  %v987_v49 = vpop.trf.xlu1  ;;  %v3175_v50 = vpop.f32.mrf.mxu2 }
 0x1f7   : > { %2043 = vst [vmem:[%s3048_s12 + $0x58] sm:$0xff] %v1915_v40  ;;  %2461 = vmatmul.msk.f32.gmra.mxu2 %vm598_vm2, %v987_v49  ;;  %2494 = vmatmul.msk.f32.gmra.mxu3 %vm598_vm2, %v987_v49  ;;  %v3178_v53 = vpop.f32.mrf.mxu3 }
 0x1f8   : > { %v1660_v27 = vmul.f32 %v1596_v12, %v1532_v10  ;;  %v1788_v23 = vmul.f32 0.5, %v1724_v13  ;;  %v1661_v42 = vmul.f32 %v1597_v21, %v1533_v6  ;;  %v1789_v25 = vmul.f32 0.5, %v1725_v24  ;;  %2390 = vmatmul.msk.f32.gmra.mxu0 %vm598_vm2, %v2910_v9  ;;  %2423 = vmatmul.msk.f32.gmra.mxu1 %vm598_vm2, %v2910_v9 }
 0x1f9   : > { %v1535_v9 = vmin.f32 %v3084_v35, %v3005_v61  ;;  %v3188_v5 = vpop.permute.xlu2 %1412 }
 0x1fa   : > { %v1852_v32 = vsub.f32 1.0, %v1788_v23  ;;  %1980 = vst [vmem:[%s3032_s23 + $0x60] sm:$0xff] %v1660_v27  ;;  %v1853_v62 = vsub.f32 1.0, %v1789_v25 }
 0x1fb   : > { %1981 = vst [vmem:[%s3032_s23 + $0x68] sm:$0xff] %v1661_v42  ;;  %v1539_v42 = vmin.f32 %v3136_v58, %v3005_v61 }
 0x1fc   : > { %v1916_v7 = vmul.f32 %v1852_v32, %v1532_v10  ;;  %v1917_v34 = vmul.f32 %v1853_v62, %v1533_v6 }
 0x1fd   : > { %v740_v38 = vpop.f32.mrf.mxu0  ;;  %v853_v41 = vpop.f32.mrf.mxu1 }
 0x1fe   : > { %2044 = vst [vmem:[%s3048_s12 + $0x60] sm:$0xff] %v1916_v7  ;;  %v1598_v43 = vsub.f32 1.0, %v740_v38  ;;  %v1726_v3 = vadd.f32 %v3042_v36, %v740_v38  ;;  %v1599_v45 = vsub.f32 1.0, %v853_v41  ;;  %v1727_v60 = vadd.f32 %v3044_v47, %v853_v41  ;;  %v988_v47 = vpop.trf.xlu1 }
 0x1ff   : > { %2045 = vst [vmem:[%s3048_s12 + $0x68] sm:$0xff] %v1917_v34  ;;  %2462 = vmatmul.msk.f32.gmra.mxu2 %vm598_vm2, %v988_v47  ;;  %2495 = vmatmul.msk.f32.gmra.mxu3 %vm598_vm2, %v988_v47  ;;  %v3204_v21 = vpop.f32.mrf.mxu3 }
 0x200   : > { %v1662_v37 = vmul.f32 %v1598_v43, %v1534_v44  ;;  %v1790_v54 = vmul.f32 0.5, %v1726_v3  ;;  %v1663_v55 = vmul.f32 %v1599_v45, %v1535_v9  ;;  %v1791_v35 = vmul.f32 0.5, %v1727_v60  ;;  %2391 = vmatmul.msk.f32.gmra.mxu0 %vm598_vm2, %v2915_v11  ;;  %2424 = vmatmul.msk.f32.gmra.mxu1 %vm598_vm2, %v2915_v11 }
 0x201   : > { %v1537_v11 = vmin.f32 %v3110_v19, %v3005_v61  ;;  %v3202_v19 = vpop.f32.mrf.mxu2  ;;  %v3214_v62 = vpop.permute.xlu2 %1417 }
 0x202   : > { %v1854_v36 = vsub.f32 1.0, %v1790_v54  ;;  %1982 = vst [vmem:[%s3032_s23 + $0x70] sm:$0xff] %v1662_v37  ;;  %v1855_v2 = vsub.f32 1.0, %v1791_v35  ;;  %v1541_v54 = vmin.f32 %v3162_v4, %v3005_v61 }
 0x203   : > { %1983 = vst [vmem:[%s3032_s23 + $0x78] sm:$0xff] %v1663_v55 }
 0x204   : > { %v1918_v28 = vmul.f32 %v1854_v36, %v1534_v44  ;;  %v1919_v8 = vmul.f32 %v1855_v2, %v1535_v9 }
 0x205   : > { %v743_v51 = vpop.f32.mrf.mxu0  ;;  %v856_v39 = vpop.f32.mrf.mxu1 }
 0x206   : > { %2046 = vst [vmem:[%s3048_s12 + $0x70] sm:$0xff] %v1918_v28  ;;  %v1600_v30 = vsub.f32 1.0, %v743_v51  ;;  %v1728_v40 = vadd.f32 %v3068_v15, %v743_v51  ;;  %v1601_v10 = vsub.f32 1.0, %v856_v39  ;;  %v1729_v6 = vadd.f32 %v3074_v31, %v856_v39  ;;  %v989_v31 = vpop.trf.xlu1 }
 0x207   : > { %2047 = vst [vmem:[%s3048_s12 + $0x78] sm:$0xff] %v1919_v8  ;;  %2463 = vmatmul.msk.f32.gmra.mxu2 %vm598_vm2, %v989_v31  ;;  %2496 = vmatmul.msk.f32.gmra.mxu3 %vm598_vm2, %v989_v31 }
 0x208   : > { %v1664_v57 = vmul.f32 %v1600_v30, %v1536_v17  ;;  %v1792_v1 = vmul.f32 0.5, %v1728_v40  ;;  %v1665_v12 = vmul.f32 %v1601_v10, %v1537_v11  ;;  %v1793_v13 = vmul.f32 0.5, %v1729_v6  ;;  %2392 = vmatmul.msk.f32.gmra.mxu0 %vm598_vm2, %v2920_v14  ;;  %2425 = vmatmul.msk.f32.gmra.mxu1 %vm598_vm2, %v2920_v14 }
 0x209   : > { %v1538_v14 = vmin.f32 %v3136_v58, %v3003_v59  ;;  %v3240_v8 = vpop.permute.xlu2 %1422  ;;  %v1542_v10 = vmin.f32 %v3188_v5, %v3003_v59  ;;  %v1543_v6 = vmin.f32 %v3188_v5, %v3005_v61 }
 0x20a   : > { %v1856_v15 = vsub.f32 1.0, %v1792_v1  ;;  %1984 = vst [vmem:[%s3032_s23 + $0x80] sm:$0xff] %v1664_v57  ;;  %v1857_v24 = vsub.f32 1.0, %v1793_v13 }
 0x20b   : > { %1985 = vst [vmem:[%s3032_s23 + $0x88] sm:$0xff] %v1665_v12 }
 0x20c   : > { %v1920_v27 = vmul.f32 %v1856_v15, %v1536_v17  ;;  %v1921_v23 = vmul.f32 %v1857_v24, %v1537_v11 }
 0x20d   : > { %v746_v25 = vpop.f32.mrf.mxu0  ;;  %v859_v32 = vpop.f32.mrf.mxu1 }
 0x20e   : > { %2048 = vst [vmem:[%s3048_s12 + $0x80] sm:$0xff] %v1920_v27  ;;  %v1602_v49 = vsub.f32 1.0, %v746_v25  ;;  %v1730_v7 = vadd.f32 %v3094_v0, %v746_v25  ;;  %v1603_v34 = vsub.f32 1.0, %v859_v32  ;;  %v1731_v44 = vadd.f32 %v3100_v48, %v859_v32  ;;  %v990_v45 = vpop.trf.xlu1  ;;  %v3228_v0 = vpop.f32.mrf.mxu2 }
 0x20f   : > { %2049 = vst [vmem:[%s3048_s12 + $0x88] sm:$0xff] %v1921_v23  ;;  %2464 = vmatmul.msk.f32.gmra.mxu2 %vm598_vm2, %v990_v45  ;;  %2497 = vmatmul.msk.f32.gmra.mxu3 %vm598_vm2, %v990_v45  ;;  %v3230_v48 = vpop.f32.mrf.mxu3 }
 0x210   : > { %v1666_v9 = vmul.f32 %v1602_v49, %v1538_v14  ;;  %v1794_v38 = vmul.f32 0.5, %v1730_v7  ;;  %v1667_v41 = vmul.f32 %v1603_v34, %v1539_v42  ;;  %v1795_v43 = vmul.f32 0.5, %v1731_v44  ;;  %2393 = vmatmul.msk.f32.gmra.mxu0 %vm598_vm2, %v2924_v16  ;;  %2426 = vmatmul.msk.f32.gmra.mxu1 %vm598_vm2, %v2924_v16 }
 0x211   : > { %v1540_v16 = vmin.f32 %v3162_v4, %v3003_v59  ;;  %v1544_v49 = vmin.f32 %v3214_v62, %v3003_v59  ;;  %v1545_v7 = vmin.f32 %v3214_v62, %v3005_v61 }
 0x212   : > { %v1858_v58 = vsub.f32 1.0, %v1794_v38  ;;  %1986 = vst [vmem:[%s3032_s23 + $0x90] sm:$0xff] %v1666_v9  ;;  %v1859_v3 = vsub.f32 1.0, %v1795_v43 }
 0x213   : > { %1987 = vst [vmem:[%s3032_s23 + $0x98] sm:$0xff] %v1667_v41 }
 0x214   : > { %v1922_v60 = vmul.f32 %v1858_v58, %v1538_v14  ;;  %v1923_v37 = vmul.f32 %v1859_v3, %v1539_v42  ;;  %v1428_v42 = vpop.permute.xlu2 %1427 }
 0x215   : > { %v749_v55 = vpop.f32.mrf.mxu0  ;;  %v862_v35 = vpop.f32.mrf.mxu1 }
 0x216   : > { %2050 = vst [vmem:[%s3048_s12 + $0x90] sm:$0xff] %v1922_v60  ;;  %v1604_v36 = vsub.f32 1.0, %v749_v55  ;;  %v1732_v2 = vadd.f32 %v3120_v56, %v749_v55  ;;  %v1605_v47 = vsub.f32 1.0, %v862_v35  ;;  %v1733_v28 = vadd.f32 %v3126_v46, %v862_v35  ;;  %v991_v30 = vpop.trf.xlu1  ;;  %v3254_v1 = vpop.f32.mrf.mxu2 }
 0x217   : > { %2051 = vst [vmem:[%s3048_s12 + $0x98] sm:$0xff] %v1923_v37  ;;  %2465 = vmatmul.msk.f32.gmra.mxu2 %vm598_vm2, %v991_v30  ;;  %2498 = vmatmul.msk.f32.gmra.mxu3 %vm598_vm2, %v991_v30  ;;  %v3256_v12 = vpop.f32.mrf.mxu3  ;;  %v1546_v55 = vmin.f32 %v3240_v8, %v3003_v59  ;;  %v1547_v35 = vmin.f32 %v3240_v8, %v3005_v61 }
 0x218   : > { %v1668_v17 = vmul.f32 %v1604_v36, %v1540_v16  ;;  %v1796_v11 = vmul.f32 0.5, %v1732_v2  ;;  %v1669_v51 = vmul.f32 %v1605_v47, %v1541_v54  ;;  %v1797_v39 = vmul.f32 0.5, %v1733_v28  ;;  %2394 = vmatmul.msk.f32.gmra.mxu0 %vm598_vm2, %v2928_v18  ;;  %2427 = vmatmul.msk.f32.gmra.mxu1 %vm598_vm2, %v2928_v18 }
 0x21a   : > { %v1860_v4 = vsub.f32 1.0, %v1796_v11  ;;  %1988 = vst [vmem:[%s3032_s23 + $0xa0] sm:$0xff] %v1668_v17  ;;  %v1861_v56 = vsub.f32 1.0, %v1797_v39 }
 0x21b   : > { %1989 = vst [vmem:[%s3032_s23 + $0xa8] sm:$0xff] %v1669_v51 }
 0x21c   : > { %v1924_v46 = vmul.f32 %v1860_v4, %v1540_v16  ;;  %v1925_v40 = vmul.f32 %v1861_v56, %v1541_v54  ;;  %v1433_v37 = vpop.permute.xlu2 %1432 }
 0x21d   : > { %v752_v18 = vpop.f32.mrf.mxu0  ;;  %v865_v57 = vpop.f32.mrf.mxu1 }
 0x21e   : > { %2052 = vst [vmem:[%s3048_s12 + $0xa0] sm:$0xff] %v1924_v46  ;;  %v1606_v13 = vsub.f32 1.0, %v752_v18  ;;  %v1734_v15 = vadd.f32 %v3146_v52, %v752_v18  ;;  %v1607_v24 = vsub.f32 1.0, %v865_v57  ;;  %v1735_v31 = vadd.f32 %v3152_v63, %v865_v57  ;;  %v3275_v43 = vpop.f32.mrf.mxu2 }
 0x21f   : > { %2053 = vst [vmem:[%s3048_s12 + $0xa8] sm:$0xff] %v1925_v40  ;;  %v3277_v58 = vpop.f32.mrf.mxu3  ;;  %v1548_v40 = vmin.f32 %v1428_v42, %v3003_v59 }
 0x220   : > { %v1670_v27 = vmul.f32 %v1606_v13, %v1542_v10  ;;  %v1798_v23 = vmul.f32 0.5, %v1734_v15  ;;  %v1671_v5 = vmul.f32 %v1607_v24, %v1543_v6  ;;  %v1799_v14 = vmul.f32 0.5, %v1735_v31  ;;  %2395 = vmatmul.msk.f32.gmra.mxu0 %vm598_vm2, %v2932_v20  ;;  %2428 = vmatmul.msk.f32.gmra.mxu1 %vm598_vm2, %v2932_v20 }
 0x222   : > { %v1862_v25 = vsub.f32 1.0, %v1798_v23  ;;  %1990 = vst [vmem:[%s3032_s23 + $0xb0] sm:$0xff] %v1670_v27  ;;  %v1863_v52 = vsub.f32 1.0, %v1799_v14 }
 0x223   : > { %1991 = vst [vmem:[%s3032_s23 + $0xb8] sm:$0xff] %v1671_v5 }
 0x224   : > { %v1926_v32 = vmul.f32 %v1862_v25, %v1542_v10  ;;  %v1927_v63 = vmul.f32 %v1863_v52, %v1543_v6  ;;  %v1549_v10 = vmin.f32 %v1428_v42, %v3005_v61  ;;  %v1438_v57 = vpop.permute.xlu2 %1437 }
 0x225   : > { %v755_v34 = vpop.f32.mrf.mxu0  ;;  %v868_v44 = vpop.f32.mrf.mxu1 }
 0x226   : > { %2054 = vst [vmem:[%s3048_s12 + $0xb0] sm:$0xff] %v1926_v32  ;;  %v1608_v9 = vsub.f32 1.0, %v755_v34  ;;  %v1736_v20 = vadd.f32 %v3175_v50, %v755_v34  ;;  %v1609_v38 = vsub.f32 1.0, %v868_v44  ;;  %v1737_v41 = vadd.f32 %v3178_v53, %v868_v44  ;;  %v3293_v11 = vpop.f32.mrf.mxu2 }
 0x227   : > { %2055 = vst [vmem:[%s3048_s12 + $0xb8] sm:$0xff] %v1927_v63  ;;  %v3296_v51 = vpop.f32.mrf.mxu3  ;;  %v1550_v32 = vmin.f32 %v1433_v37, %v3003_v59  ;;  %v1551_v63 = vmin.f32 %v1433_v37, %v3005_v61  ;;  %v1552_v37 = vmin.f32 %v1438_v57, %v3003_v59 }
 0x228   : > { %v1672_v3 = vmul.f32 %v1608_v9, %v1544_v49  ;;  %v1800_v45 = vmul.f32 0.5, %v1736_v20  ;;  %v1673_v62 = vmul.f32 %v1609_v38, %v1545_v7  ;;  %v1801_v60 = vmul.f32 0.5, %v1737_v41  ;;  %2396 = vmatmul.msk.f32.gmra.mxu0 %vm598_vm2, %v2936_v22  ;;  %2429 = vmatmul.msk.f32.gmra.mxu1 %vm598_vm2, %v2936_v22 }
 0x22a   : > { %v1864_v50 = vsub.f32 1.0, %v1800_v45  ;;  %1992 = vst [vmem:[%s3032_s23 + $0xc0] sm:$0xff] %v1672_v3  ;;  %v1865_v53 = vsub.f32 1.0, %v1801_v60 }
 0x22b   : > { %1993 = vst [vmem:[%s3032_s23 + $0xc8] sm:$0xff] %v1673_v62 }
 0x22c   : > { %v1928_v16 = vmul.f32 %v1864_v50, %v1544_v49  ;;  %v1929_v54 = vmul.f32 %v1865_v53, %v1545_v7  ;;  %v3326_v20 = vpop.permute.xlu2 %1452 }
 0x22d   : > { %v758_v36 = vpop.f32.mrf.mxu0  ;;  %v871_v2 = vpop.f32.mrf.mxu1 }
 0x22e   : > { %2056 = vst [vmem:[%s3048_s12 + $0xc0] sm:$0xff] %v1928_v16  ;;  %v1610_v47 = vsub.f32 1.0, %v758_v36  ;;  %v1738_v22 = vadd.f32 %v3202_v19, %v758_v36  ;;  %v1611_v28 = vsub.f32 1.0, %v871_v2  ;;  %v1739_v17 = vadd.f32 %v3204_v21, %v871_v2  ;;  %v3314_v14 = vpop.f32.mrf.mxu2 }
 0x22f   : > { %2057 = vst [vmem:[%s3048_s12 + $0xc8] sm:$0xff] %v1929_v54  ;;  %v3316_v42 = vpop.f32.mrf.mxu3  ;;  %v1553_v16 = vmin.f32 %v1438_v57, %v3005_v61 }
 0x230   : > { %v1674_v39 = vmul.f32 %v1610_v47, %v1546_v55  ;;  %v1802_v4 = vmul.f32 0.5, %v1738_v22  ;;  %v1675_v8 = vmul.f32 %v1611_v28, %v1547_v35  ;;  %v1803_v56 = vmul.f32 0.5, %v1739_v17  ;;  %2397 = vmatmul.msk.f32.gmra.mxu0 %vm598_vm2, %v2944_v26  ;;  %2430 = vmatmul.msk.f32.gmra.mxu1 %vm598_vm2, %v2944_v26 }
 0x232   : > { %v1866_v19 = vsub.f32 1.0, %v1802_v4  ;;  %1994 = vst [vmem:[%s3032_s23 + $0xd0] sm:$0xff] %v1674_v39  ;;  %v1867_v21 = vsub.f32 1.0, %v1803_v56  ;;  %v1443_v39 = vpop.permute.xlu0 %1442 }
 0x233   : > { %1995 = vst [vmem:[%s3032_s23 + $0xd8] sm:$0xff] %v1675_v8 }
 0x234   : > { %v1930_v30 = vmul.f32 %v1866_v19, %v1546_v55  ;;  %v1931_v46 = vmul.f32 %v1867_v21, %v1547_v35  ;;  %v3344_v4 = vpop.permute.xlu2 %1457 }
 0x235   : > { %v761_v6 = vpop.f32.mrf.mxu0  ;;  %v874_v18 = vpop.f32.mrf.mxu1 }
 0x236   : > { %2058 = vst [vmem:[%s3048_s12 + $0xd0] sm:$0xff] %v1930_v30  ;;  %v1612_v13 = vsub.f32 1.0, %v761_v6  ;;  %v1740_v26 = vadd.f32 %v3228_v0, %v761_v6  ;;  %v1613_v15 = vsub.f32 1.0, %v874_v18  ;;  %v1741_v24 = vadd.f32 %v3230_v48, %v874_v18  ;;  %v3333_v60 = vpop.f32.mrf.mxu2 }
 0x237   : > { %2059 = vst [vmem:[%s3048_s12 + $0xd8] sm:$0xff] %v1931_v46 }
 0x238   : > { %v1676_v31 = vmul.f32 %v1612_v13, %v1548_v40  ;;  %v1804_v27 = vmul.f32 0.5, %v1740_v26  ;;  %v1677_v23 = vmul.f32 %v1613_v15, %v1549_v10  ;;  %v1805_v5 = vmul.f32 0.5, %v1741_v24  ;;  %2398 = vmatmul.msk.f32.gmra.mxu0 %vm598_vm2, %v2950_v29  ;;  %2431 = vmatmul.msk.f32.gmra.mxu1 %vm598_vm2, %v2950_v29 }
 0x23a   : > { %v1868_v0 = vsub.f32 1.0, %v1804_v27  ;;  %1996 = vst [vmem:[%s3032_s23 + $0xe0] sm:$0xff] %v1676_v31  ;;  %v1869_v48 = vsub.f32 1.0, %v1805_v5  ;;  %v1448_v27 = vpop.permute.xlu1 %1447 }
 0x23b   : > { %1997 = vst [vmem:[%s3032_s23 + $0xe8] sm:$0xff] %v1677_v23 }
 0x23c   : > { %v1932_v25 = vmul.f32 %v1868_v0, %v1548_v40  ;;  %v1933_v52 = vmul.f32 %v1869_v48, %v1549_v10  ;;  %v3360_v0 = vpop.permute.xlu2 %1462 }
 0x23d   : > { %v764_v49 = vpop.f32.mrf.mxu0  ;;  %v877_v7 = vpop.f32.mrf.mxu1 }
 0x23e   : > { %2060 = vst [vmem:[%s3048_s12 + $0xe0] sm:$0xff] %v1932_v25  ;;  %v1614_v29 = vsub.f32 1.0, %v764_v49  ;;  %v1742_v34 = vadd.f32 %v3254_v1, %v764_v49  ;;  %v1615_v44 = vsub.f32 1.0, %v877_v7  ;;  %v1743_v9 = vadd.f32 %v3256_v12, %v877_v7  ;;  %v3335_v12 = vpop.f32.mrf.mxu3  ;;  %v3350_v30 = vpop.f32.mrf.mxu2 }
 0x23f   : > { %2061 = vst [vmem:[%s3048_s12 + $0xe8] sm:$0xff] %v1933_v52 }
 0x240   : > { %v1678_v38 = vmul.f32 %v1614_v29, %v1550_v32  ;;  %v1806_v41 = vmul.f32 0.5, %v1742_v34  ;;  %v1679_v3 = vmul.f32 %v1615_v44, %v1551_v63  ;;  %v1807_v45 = vmul.f32 0.5, %v1743_v9  ;;  %2399 = vmatmul.msk.f32.gmra.mxu0 %vm598_vm2, %v2956_v33  ;;  %2432 = vmatmul.msk.f32.gmra.mxu1 %vm598_vm2, %v2956_v33 }
 0x242   : > { %v1870_v62 = vsub.f32 1.0, %v1806_v41  ;;  %1998 = vst [vmem:[%s3032_s23 + $0xf0] sm:$0xff] %v1678_v38  ;;  %v1871_v1 = vsub.f32 1.0, %v1807_v45 }
 0x243   : > { %1999 = vst [vmem:[%s3032_s23 + $0xf8] sm:$0xff] %v1679_v3 }
 0x244   : > { %v1934_v50 = vmul.f32 %v1870_v62, %v1550_v32  ;;  %v1935_v53 = vmul.f32 %v1871_v1, %v1551_v63 }
 0x245   : > { %v767_v54 = vpop.f32.mrf.mxu0  ;;  %v880_v55 = vpop.f32.mrf.mxu1 }
 0x246   : > { %2062 = vst [vmem:[%s3048_s12 + $0xf0] sm:$0xff] %v1934_v50  ;;  %v1616_v33 = vsub.f32 1.0, %v767_v54  ;;  %v1617_v35 = vsub.f32 1.0, %v880_v55  ;;  %v1744_v36 = vadd.f32 %v3275_v43, %v767_v54  ;;  %v1745_v2 = vadd.f32 %v3277_v58, %v880_v55  ;;  %v3352_v46 = vpop.f32.mrf.mxu3 }
 0x247   : > { %2063 = vst [vmem:[%s3048_s12 + $0xf8] sm:$0xff] %v1935_v53  ;;  %v1554_v43 = vmin.f32 %v1443_v39, %v3003_v59  ;;  %v1555_v58 = vmin.f32 %v1443_v39, %v3005_v61 }
 0x248   : > { %v1680_v47 = vmul.f32 %v1616_v33, %v1552_v37  ;;  %v1681_v22 = vmul.f32 %v1617_v35, %v1553_v16  ;;  %v1808_v28 = vmul.f32 0.5, %v1744_v36  ;;  %v1809_v17 = vmul.f32 0.5, %v1745_v2 }
 0x24a   : > { %2000 = vst [vmem:[%s3032_s23 + $0x100] sm:$0xff] %v1680_v47  ;;  %v1872_v8 = vsub.f32 1.0, %v1808_v28  ;;  %v1873_v56 = vsub.f32 1.0, %v1809_v17  ;;  %v3367_v34 = vpop.f32.mrf.mxu2 }
 0x24b   : > { %2001 = vst [vmem:[%s3032_s23 + $0x108] sm:$0xff] %v1681_v22 }
 0x24c   : > { %v1936_v19 = vmul.f32 %v1872_v8, %v1552_v37  ;;  %v1937_v21 = vmul.f32 %v1873_v56, %v1553_v16  ;;  %v3378_v16 = vpop.permute.xlu2 %1467 }
 0x24d   : > { %v770_v40 = vpop.f32.mrf.mxu0  ;;  %v883_v10 = vpop.f32.mrf.mxu1 }
 0x24e   : > { %2064 = vst [vmem:[%s3048_s12 + $0x100] sm:$0xff] %v1936_v19  ;;  %v1618_v6 = vsub.f32 1.0, %v770_v40  ;;  %v1619_v18 = vsub.f32 1.0, %v883_v10  ;;  %v1746_v57 = vadd.f32 %v3293_v11, %v770_v40  ;;  %v1747_v13 = vadd.f32 %v3296_v51, %v883_v10  ;;  %v3369_v44 = vpop.f32.mrf.mxu3 }
 0x24f   : > { %2065 = vst [vmem:[%s3048_s12 + $0x108] sm:$0xff] %v1937_v21  ;;  %v1556_v11 = vmin.f32 %v1448_v27, %v3003_v59  ;;  %v1557_v51 = vmin.f32 %v1448_v27, %v3005_v61 }
 0x250   : > { %v1682_v26 = vmul.f32 %v1618_v6, %v1554_v43  ;;  %v1683_v15 = vmul.f32 %v1619_v18, %v1555_v58  ;;  %v1810_v24 = vmul.f32 0.5, %v1746_v57  ;;  %v1811_v31 = vmul.f32 0.5, %v1747_v13 }
 0x252   : > { %2002 = vst [vmem:[%s3032_s23 + $0x110] sm:$0xff] %v1682_v26  ;;  %v1874_v23 = vsub.f32 1.0, %v1810_v24  ;;  %v1875_v5 = vsub.f32 1.0, %v1811_v31 }
 0x253   : > { %2003 = vst [vmem:[%s3032_s23 + $0x118] sm:$0xff] %v1683_v15 }
 0x254   : > { %v1938_v48 = vmul.f32 %v1874_v23, %v1554_v43  ;;  %v1939_v25 = vmul.f32 %v1875_v5, %v1555_v58  ;;  %v1473_v6 = vpop.permute.xlu2 %1472 }
 0x255   : > { %v773_v52 = vpop.f32.mrf.mxu0  ;;  %v886_v32 = vpop.f32.mrf.mxu1 }
 0x256   : > { %2066 = vst [vmem:[%s3048_s12 + $0x110] sm:$0xff] %v1938_v48  ;;  %v1620_v63 = vsub.f32 1.0, %v773_v52  ;;  %v1621_v49 = vsub.f32 1.0, %v886_v32  ;;  %v1748_v7 = vadd.f32 %v3314_v14, %v773_v52  ;;  %v1749_v29 = vadd.f32 %v3316_v42, %v886_v32  ;;  %v1292_v28 = vpop.f32.mrf.mxu3 }
 0x257   : > { %2067 = vst [vmem:[%s3048_s12 + $0x118] sm:$0xff] %v1939_v25  ;;  %v1558_v14 = vmin.f32 %v3326_v20, %v3003_v59  ;;  %v1559_v42 = vmin.f32 %v3326_v20, %v3005_v61  ;;  %v1179_v20 = vpop.f32.mrf.mxu2 }
 0x258   : > { %v1684_v9 = vmul.f32 %v1620_v63, %v1556_v11  ;;  %v1685_v38 = vmul.f32 %v1621_v49, %v1557_v51  ;;  %v1812_v41 = vmul.f32 0.5, %v1748_v7  ;;  %v1813_v3 = vmul.f32 0.5, %v1749_v29 }
 0x25a   : > { %2004 = vst [vmem:[%s3032_s23 + $0x120] sm:$0xff] %v1684_v9  ;;  %v1876_v45 = vsub.f32 1.0, %v1812_v41  ;;  %v1877_v62 = vsub.f32 1.0, %v1813_v3 }
 0x25b   : > { %2005 = vst [vmem:[%s3032_s23 + $0x128] sm:$0xff] %v1685_v38 }
 0x25c   : > { %v1940_v1 = vmul.f32 %v1876_v45, %v1556_v11  ;;  %v1941_v50 = vmul.f32 %v1877_v62, %v1557_v51  ;;  %v1478_v29 = vpop.permute.xlu2 %1477 }
 0x25d   : > { %v776_v53 = vpop.f32.mrf.mxu0  ;;  %v889_v37 = vpop.f32.mrf.mxu1 }
 0x25e   : > { %2068 = vst [vmem:[%s3048_s12 + $0x120] sm:$0xff] %v1940_v1  ;;  %v1622_v54 = vsub.f32 1.0, %v776_v53  ;;  %v1623_v55 = vsub.f32 1.0, %v889_v37  ;;  %v1750_v33 = vadd.f32 %v3333_v60, %v776_v53  ;;  %v1751_v35 = vadd.f32 %v3335_v12, %v889_v37  ;;  %v1295_v31 = vpop.f32.mrf.mxu3 }
 0x25f   : > { %2069 = vst [vmem:[%s3048_s12 + $0x128] sm:$0xff] %v1941_v50  ;;  %v1560_v60 = vmin.f32 %v3344_v4, %v3003_v59  ;;  %v1561_v12 = vmin.f32 %v3344_v4, %v3005_v61  ;;  %v1182_v24 = vpop.f32.mrf.mxu2 }
 0x260   : > { %v1686_v36 = vmul.f32 %v1622_v54, %v1558_v14  ;;  %v1687_v2 = vmul.f32 %v1623_v55, %v1559_v42  ;;  %v1814_v47 = vmul.f32 0.5, %v1750_v33  ;;  %v1815_v22 = vmul.f32 0.5, %v1751_v35 }
 0x262   : > { %2006 = vst [vmem:[%s3032_s23 + $0x130] sm:$0xff] %v1686_v36  ;;  %v1878_v17 = vsub.f32 1.0, %v1814_v47  ;;  %v1879_v39 = vsub.f32 1.0, %v1815_v22  ;;  %v1566_v22 = vmin.f32 %v1473_v6, %v3003_v59 }
 0x263   : > { %2007 = vst [vmem:[%s3032_s23 + $0x138] sm:$0xff] %v1687_v2 }
 0x264   : > { %v1942_v8 = vmul.f32 %v1878_v17, %v1558_v14  ;;  %v1943_v56 = vmul.f32 %v1879_v39, %v1559_v42 }
 0x265   : > { %v779_v19 = vpop.f32.mrf.mxu0  ;;  %v892_v21 = vpop.f32.mrf.mxu1 }
 0x266   : > { %2070 = vst [vmem:[%s3048_s12 + $0x130] sm:$0xff] %v1942_v8  ;;  %v1624_v43 = vsub.f32 1.0, %v779_v19  ;;  %v1625_v58 = vsub.f32 1.0, %v892_v21  ;;  %v1752_v40 = vadd.f32 %v3350_v30, %v779_v19  ;;  %v1753_v10 = vadd.f32 %v3352_v46, %v892_v21  ;;  %v1298_v45 = vpop.f32.mrf.mxu3 }
 0x267   : > { %2071 = vst [vmem:[%s3048_s12 + $0x138] sm:$0xff] %v1943_v56  ;;  %v1562_v30 = vmin.f32 %v3360_v0, %v3003_v59  ;;  %v1563_v46 = vmin.f32 %v3360_v0, %v3005_v61  ;;  %v1185_v3 = vpop.f32.mrf.mxu2 }
 0x268   : > { %v1688_v18 = vmul.f32 %v1624_v43, %v1560_v60  ;;  %v1689_v57 = vmul.f32 %v1625_v58, %v1561_v12  ;;  %v1816_v13 = vmul.f32 0.5, %v1752_v40  ;;  %v1817_v26 = vmul.f32 0.5, %v1753_v10 }
 0x26a   : > { %2008 = vst [vmem:[%s3032_s23 + $0x140] sm:$0xff] %v1688_v18  ;;  %v1880_v15 = vsub.f32 1.0, %v1816_v13  ;;  %v1881_v4 = vsub.f32 1.0, %v1817_v26  ;;  %v1568_v13 = vmin.f32 %v1478_v29, %v3003_v59  ;;  %v1569_v26 = vmin.f32 %v1478_v29, %v3005_v61 }
 0x26b   : > { %2009 = vst [vmem:[%s3032_s23 + $0x148] sm:$0xff] %v1689_v57 }
 0x26c   : > { %v1944_v27 = vmul.f32 %v1880_v15, %v1560_v60  ;;  %v1945_v23 = vmul.f32 %v1881_v4, %v1561_v12 }
 0x26d   : > { %v782_v5 = vpop.f32.mrf.mxu0  ;;  %v895_v48 = vpop.f32.mrf.mxu1 }
 0x26e   : > { %2072 = vst [vmem:[%s3048_s12 + $0x140] sm:$0xff] %v1944_v27  ;;  %v1626_v25 = vsub.f32 1.0, %v782_v5  ;;  %v1627_v11 = vsub.f32 1.0, %v895_v48  ;;  %v1754_v51 = vadd.f32 %v3367_v34, %v782_v5  ;;  %v1755_v52 = vadd.f32 %v3369_v44, %v895_v48  ;;  %v1301_v19 = vpop.f32.mrf.mxu3 }
 0x26f   : > { %2073 = vst [vmem:[%s3048_s12 + $0x148] sm:$0xff] %v1945_v23  ;;  %v1564_v34 = vmin.f32 %v3378_v16, %v3003_v59  ;;  %v1565_v44 = vmin.f32 %v3378_v16, %v3005_v61  ;;  %v1483_v16 = vpop.permute.xlu2 %1482  ;;  %v1188_v12 = vpop.f32.mrf.mxu2 }
 0x270   : > { %v1690_v32 = vmul.f32 %v1626_v25, %v1562_v30  ;;  %v1691_v63 = vmul.f32 %v1627_v11, %v1563_v46  ;;  %v1818_v49 = vmul.f32 0.5, %v1754_v51  ;;  %v1819_v7 = vmul.f32 0.5, %v1755_v52 }
 0x271   : > { %v1571_v29 = vmin.f32 %v1483_v16, %v3005_v61 }
 0x272   : > { %2010 = vst [vmem:[%s3032_s23 + $0x150] sm:$0xff] %v1690_v32  ;;  %v1882_v9 = vsub.f32 1.0, %v1818_v49  ;;  %v1883_v0 = vsub.f32 1.0, %v1819_v7  ;;  %v1570_v7 = vmin.f32 %v1483_v16, %v3003_v59 }
 0x273   : > { %2011 = vst [vmem:[%s3032_s23 + $0x158] sm:$0xff] %v1691_v63 }
 0x274   : > { %v1946_v38 = vmul.f32 %v1882_v9, %v1562_v30  ;;  %v1947_v41 = vmul.f32 %v1883_v0, %v1563_v46 }
 0x275   : > { %v785_v62 = vpop.f32.mrf.mxu0  ;;  %v898_v1 = vpop.f32.mrf.mxu1 }
 0x276   : > { %2074 = vst [vmem:[%s3048_s12 + $0x150] sm:$0xff] %v1946_v38  ;;  %v1628_v50 = vsub.f32 1.0, %v785_v62  ;;  %v1629_v14 = vsub.f32 1.0, %v898_v1  ;;  %v1756_v42 = vadd.f32 %v1179_v20, %v785_v62  ;;  %v1757_v53 = vadd.f32 %v1292_v28, %v898_v1  ;;  %v1304_v51 = vpop.f32.mrf.mxu3 }
 0x277   : > { %2075 = vst [vmem:[%s3048_s12 + $0x158] sm:$0xff] %v1947_v41  ;;  %v1567_v20 = vmin.f32 %v1473_v6, %v3005_v61  ;;  %v1488_v30 = vpop.permute.xlu2 %1487  ;;  %v1191_v11 = vpop.f32.mrf.mxu2 }
 0x278   : > { %v1692_v37 = vmul.f32 %v1628_v50, %v1564_v34  ;;  %v1693_v54 = vmul.f32 %v1629_v14, %v1565_v44  ;;  %v1820_v55 = vmul.f32 0.5, %v1756_v42  ;;  %v1821_v33 = vmul.f32 0.5, %v1757_v53 }
 0x27a   : > { %2012 = vst [vmem:[%s3032_s23 + $0x160] sm:$0xff] %v1692_v37  ;;  %v1884_v35 = vsub.f32 1.0, %v1820_v55  ;;  %v1885_v36 = vsub.f32 1.0, %v1821_v33  ;;  %v1572_v33 = vmin.f32 %v1488_v30, %v3003_v59 }
 0x27b   : > { %2013 = vst [vmem:[%s3032_s23 + $0x168] sm:$0xff] %v1693_v54 }
 0x27c   : > { %v1948_v2 = vmul.f32 %v1884_v35, %v1564_v34  ;;  %v1949_v47 = vmul.f32 %v1885_v36, %v1565_v44  ;;  %v1573_v35 = vmin.f32 %v1488_v30, %v3005_v61 }
 0x27d   : > { %v788_v28 = vpop.f32.mrf.mxu0  ;;  %v901_v17 = vpop.f32.mrf.mxu1 }
 0x27e   : > { %2076 = vst [vmem:[%s3048_s12 + $0x160] sm:$0xff] %v1948_v2  ;;  %v1630_v39 = vsub.f32 1.0, %v788_v28  ;;  %v1631_v8 = vsub.f32 1.0, %v901_v17  ;;  %v1758_v56 = vadd.f32 %v1182_v24, %v788_v28  ;;  %v1759_v60 = vadd.f32 %v1295_v31, %v901_v17  ;;  %v1307_v37 = vpop.f32.mrf.mxu3 }
 0x27f   : > { %2077 = vst [vmem:[%s3048_s12 + $0x168] sm:$0xff] %v1949_v47  ;;  %v1493_v50 = vpop.permute.xlu2 %1492  ;;  %v1194_v53 = vpop.f32.mrf.mxu2 }
 0x280   : > { %v1694_v21 = vmul.f32 %v1630_v39, %v1566_v22  ;;  %v1695_v43 = vmul.f32 %v1631_v8, %v1567_v20  ;;  %v1822_v58 = vmul.f32 0.5, %v1758_v56  ;;  %v1823_v40 = vmul.f32 0.5, %v1759_v60 }
 0x282   : > { %2014 = vst [vmem:[%s3032_s23 + $0x170] sm:$0xff] %v1694_v21  ;;  %v1886_v10 = vsub.f32 1.0, %v1822_v58  ;;  %v1887_v6 = vsub.f32 1.0, %v1823_v40  ;;  %v1574_v40 = vmin.f32 %v1493_v50, %v3003_v59 }
 0x283   : > { %2015 = vst [vmem:[%s3032_s23 + $0x178] sm:$0xff] %v1695_v43 }
 0x284   : > { %v1950_v18 = vmul.f32 %v1886_v10, %v1566_v22  ;;  %v1951_v57 = vmul.f32 %v1887_v6, %v1567_v20  ;;  %v1575_v10 = vmin.f32 %v1493_v50, %v3005_v61 }
 0x285   : > { %v791_v15 = vpop.f32.mrf.mxu0  ;;  %v904_v4 = vpop.f32.mrf.mxu1 }
 0x286   : > { %2078 = vst [vmem:[%s3048_s12 + $0x170] sm:$0xff] %v1950_v18  ;;  %v1632_v24 = vsub.f32 1.0, %v791_v15  ;;  %v1633_v31 = vsub.f32 1.0, %v904_v4  ;;  %v1760_v27 = vadd.f32 %v1185_v3, %v791_v15  ;;  %v1761_v23 = vadd.f32 %v1298_v45, %v904_v4  ;;  %v1310_v58 = vpop.f32.mrf.mxu3 }
 0x287   : > { %2079 = vst [vmem:[%s3048_s12 + $0x178] sm:$0xff] %v1951_v57  ;;  %v1197_v43 = vpop.f32.mrf.mxu2 }
 0x288   : > { %v1696_v46 = vmul.f32 %v1632_v24, %v1568_v13  ;;  %v1697_v5 = vmul.f32 %v1633_v31, %v1569_v26  ;;  %v1824_v48 = vmul.f32 0.5, %v1760_v27  ;;  %v1825_v25 = vmul.f32 0.5, %v1761_v23 }
 0x28a   : > { %2016 = vst [vmem:[%s3032_s23 + $0x180] sm:$0xff] %v1696_v46  ;;  %v1888_v52 = vsub.f32 1.0, %v1824_v48  ;;  %v1889_v32 = vsub.f32 1.0, %v1825_v25 }
 0x28b   : > { %2017 = vst [vmem:[%s3032_s23 + $0x188] sm:$0xff] %v1697_v5 }
 0x28c   : > { %v1952_v63 = vmul.f32 %v1888_v52, %v1568_v13  ;;  %v1953_v49 = vmul.f32 %v1889_v32, %v1569_v26 }
 0x28d   : > { %v794_v9 = vpop.f32.mrf.mxu0  ;;  %v907_v0 = vpop.f32.mrf.mxu1 }
 0x28e   : > { %2080 = vst [vmem:[%s3048_s12 + $0x180] sm:$0xff] %v1952_v63  ;;  %v1634_v38 = vsub.f32 1.0, %v794_v9  ;;  %v1635_v41 = vsub.f32 1.0, %v907_v0  ;;  %v1762_v3 = vadd.f32 %v1188_v12, %v794_v9  ;;  %v1763_v45 = vadd.f32 %v1301_v19, %v907_v0  ;;  %v1498_v12 = vpop.permute.xlu2 %1497  ;;  %v1313_v9 = vpop.f32.mrf.mxu3 }
 0x28f   : > { %2081 = vst [vmem:[%s3048_s12 + $0x188] sm:$0xff] %v1953_v49  ;;  %v1576_v48 = vmin.f32 %v1498_v12, %v3003_v59  ;;  %v1577_v25 = vmin.f32 %v1498_v12, %v3005_v61 }
 0x290   : > { %v1698_v34 = vmul.f32 %v1634_v38, %v1570_v7  ;;  %v1699_v44 = vmul.f32 %v1635_v41, %v1571_v29  ;;  %v1826_v62 = vmul.f32 0.5, %v1762_v3  ;;  %v1827_v1 = vmul.f32 0.5, %v1763_v45 }
 0x292   : > { %2018 = vst [vmem:[%s3032_s23 + $0x190] sm:$0xff] %v1698_v34  ;;  %v1890_v14 = vsub.f32 1.0, %v1826_v62  ;;  %v1891_v42 = vsub.f32 1.0, %v1827_v1 }
 0x293   : > { %2019 = vst [vmem:[%s3032_s23 + $0x198] sm:$0xff] %v1699_v44 }
 0x294   : > { %v1954_v54 = vmul.f32 %v1890_v14, %v1570_v7  ;;  %v1955_v55 = vmul.f32 %v1891_v42, %v1571_v29  ;;  %v1200_v29 = vpop.f32.mrf.mxu2 }
 0x295   : > { %v797_v36 = vpop.f32.mrf.mxu0  ;;  %v910_v16 = vpop.f32.mrf.mxu1 }
 0x296   : > { %2082 = vst [vmem:[%s3048_s12 + $0x190] sm:$0xff] %v1954_v54  ;;  %v1636_v2 = vsub.f32 1.0, %v797_v36  ;;  %v1637_v47 = vsub.f32 1.0, %v910_v16  ;;  %v1764_v22 = vadd.f32 %v1191_v11, %v797_v36  ;;  %v1765_v20 = vadd.f32 %v1304_v51, %v910_v16  ;;  %v1503_v52 = vpop.permute.xlu2 %1502 }
 0x297   : > { %2083 = vst [vmem:[%s3048_s12 + $0x198] sm:$0xff] %v1955_v55  ;;  %v1578_v1 = vmin.f32 %v1503_v52, %v3003_v59  ;;  %v1579_v50 = vmin.f32 %v1503_v52, %v3005_v61 }
 0x298   : > { %v1700_v28 = vmul.f32 %v1636_v2, %v1572_v33  ;;  %v1701_v17 = vmul.f32 %v1637_v47, %v1573_v35  ;;  %v1828_v39 = vmul.f32 0.5, %v1764_v22  ;;  %v1829_v8 = vmul.f32 0.5, %v1765_v20  ;;  %v1316_v22 = vpop.f32.mrf.mxu3 }
 0x29a   : > { %2020 = vst [vmem:[%s3032_s23 + $0x1a0] sm:$0xff] %v1700_v28  ;;  %v1892_v56 = vsub.f32 1.0, %v1828_v39  ;;  %v1893_v60 = vsub.f32 1.0, %v1829_v8 }
 0x29b   : > { %2021 = vst [vmem:[%s3032_s23 + $0x1a8] sm:$0xff] %v1701_v17 }
 0x29c   : > { %v1956_v19 = vmul.f32 %v1892_v56, %v1572_v33  ;;  %v1957_v21 = vmul.f32 %v1893_v60, %v1573_v35  ;;  %v1203_v47 = vpop.f32.mrf.mxu2 }
 0x29d   : > { %v800_v6 = vpop.f32.mrf.mxu0  ;;  %v913_v18 = vpop.f32.mrf.mxu1 }
 0x29e   : > { %2084 = vst [vmem:[%s3048_s12 + $0x1a0] sm:$0xff] %v1956_v19  ;;  %v1638_v57 = vsub.f32 1.0, %v800_v6  ;;  %v1639_v13 = vsub.f32 1.0, %v913_v18  ;;  %v1766_v26 = vadd.f32 %v1194_v53, %v800_v6  ;;  %v1767_v15 = vadd.f32 %v1307_v37, %v913_v18  ;;  %v1508_v33 = vpop.permute.xlu2 %1507 }
 0x29f   : > { %2085 = vst [vmem:[%s3048_s12 + $0x1a8] sm:$0xff] %v1957_v21  ;;  %v1580_v8 = vmin.f32 %v1508_v33, %v3003_v59  ;;  %v1581_v56 = vmin.f32 %v1508_v33, %v3005_v61 }
 0x2a0   : > { %v1702_v4 = vmul.f32 %v1638_v57, %v1574_v40  ;;  %v1703_v24 = vmul.f32 %v1639_v13, %v1575_v10  ;;  %v1830_v31 = vmul.f32 0.5, %v1766_v26  ;;  %v1831_v27 = vmul.f32 0.5, %v1767_v15 }
 0x2a2   : > { %2022 = vst [vmem:[%s3032_s23 + $0x1b0] sm:$0xff] %v1702_v4  ;;  %v1894_v23 = vsub.f32 1.0, %v1830_v31  ;;  %v1895_v30 = vsub.f32 1.0, %v1831_v27  ;;  %v1319_v4 = vpop.f32.mrf.mxu3 }
 0x2a3   : > { %2023 = vst [vmem:[%s3032_s23 + $0x1b8] sm:$0xff] %v1703_v24 }
 0x2a4   : > { %v1958_v46 = vmul.f32 %v1894_v23, %v1574_v40  ;;  %v1959_v5 = vmul.f32 %v1895_v30, %v1575_v10  ;;  %v1206_v15 = vpop.f32.mrf.mxu2 }
 0x2a5   : > { %v803_v11 = vpop.f32.mrf.mxu0  ;;  %v916_v51 = vpop.f32.mrf.mxu1 }
 0x2a6   : > { %2086 = vst [vmem:[%s3048_s12 + $0x1b0] sm:$0xff] %v1958_v46  ;;  %v1640_v32 = vsub.f32 1.0, %v803_v11  ;;  %v1641_v63 = vsub.f32 1.0, %v916_v51  ;;  %v1768_v49 = vadd.f32 %v1197_v43, %v803_v11  ;;  %v1769_v7 = vadd.f32 %v1310_v58, %v916_v51  ;;  %v1513_v57 = vpop.permute.xlu2 %1512 }
 0x2a7   : > { %2087 = vst [vmem:[%s3048_s12 + $0x1b8] sm:$0xff] %v1959_v5  ;;  %v1582_v27 = vmin.f32 %v1513_v57, %v3003_v59  ;;  %v1583_v23 = vmin.f32 %v1513_v57, %v3005_v61 }
 0x2a8   : > { %v1704_v0 = vmul.f32 %v1640_v32, %v1576_v48  ;;  %v1705_v38 = vmul.f32 %v1641_v63, %v1577_v25  ;;  %v1832_v41 = vmul.f32 0.5, %v1768_v49  ;;  %v1833_v3 = vmul.f32 0.5, %v1769_v7 }
 0x2aa   : > { %2024 = vst [vmem:[%s3032_s23 + $0x1c0] sm:$0xff] %v1704_v0  ;;  %v1896_v45 = vsub.f32 1.0, %v1832_v41  ;;  %v1897_v34 = vsub.f32 1.0, %v1833_v3 }
 0x2ab   : > { %2025 = vst [vmem:[%s3032_s23 + $0x1c8] sm:$0xff] %v1705_v38 }
 0x2ac   : > { %v1960_v44 = vmul.f32 %v1896_v45, %v1576_v48  ;;  %v1961_v62 = vmul.f32 %v1897_v34, %v1577_v25 }
 0x2ad   : > { %v806_v14 = vpop.f32.mrf.mxu0  ;;  %v919_v42 = vpop.f32.mrf.mxu1 }
 0x2ae   : > { %2088 = vst [vmem:[%s3048_s12 + $0x1c0] sm:$0xff] %v1960_v44  ;;  %v1642_v53 = vsub.f32 1.0, %v806_v14  ;;  %v1643_v37 = vsub.f32 1.0, %v919_v42  ;;  %v1770_v54 = vadd.f32 %v1200_v29, %v806_v14  ;;  %v1771_v55 = vadd.f32 %v1313_v9, %v919_v42 }
 0x2af   : > { %2089 = vst [vmem:[%s3048_s12 + $0x1c8] sm:$0xff] %v1961_v62 }
 0x2b0   : > { %v1706_v35 = vmul.f32 %v1642_v53, %v1578_v1  ;;  %v1707_v36 = vmul.f32 %v1643_v37, %v1579_v50  ;;  %v1834_v16 = vmul.f32 0.5, %v1770_v54  ;;  %v1835_v2 = vmul.f32 0.5, %v1771_v55 }
 0x2b2   : > { %2026 = vst [vmem:[%s3032_s23 + $0x1d0] sm:$0xff] %v1706_v35  ;;  %v1898_v20 = vsub.f32 1.0, %v1834_v16  ;;  %v1899_v28 = vsub.f32 1.0, %v1835_v2 }
 0x2b3   : > { %2027 = vst [vmem:[%s3032_s23 + $0x1d8] sm:$0xff] %v1707_v36 }
 0x2b4   : > { %v1962_v17 = vmul.f32 %v1898_v20, %v1578_v1  ;;  %v1963_v39 = vmul.f32 %v1899_v28, %v1579_v50 }
 0x2b5   : > { %v809_v60 = vpop.f32.mrf.mxu0  ;;  %v922_v12 = vpop.f32.mrf.mxu1 }
 0x2b6   : > { %2090 = vst [vmem:[%s3048_s12 + $0x1d0] sm:$0xff] %v1962_v17  ;;  %v1644_v19 = vsub.f32 1.0, %v809_v60  ;;  %v1645_v21 = vsub.f32 1.0, %v922_v12  ;;  %v1772_v43 = vadd.f32 %v1203_v47, %v809_v60  ;;  %v1773_v58 = vadd.f32 %v1316_v22, %v922_v12 }
 0x2b7   : > { %2091 = vst [vmem:[%s3048_s12 + $0x1d8] sm:$0xff] %v1963_v39 }
 0x2b8   : > { %v1708_v40 = vmul.f32 %v1644_v19, %v1580_v8  ;;  %v1709_v10 = vmul.f32 %v1645_v21, %v1581_v56  ;;  %v1836_v6 = vmul.f32 0.5, %v1772_v43  ;;  %v1837_v18 = vmul.f32 0.5, %v1773_v58 }
 0x2ba   : > { %2028 = vst [vmem:[%s3032_s23 + $0x1e0] sm:$0xff] %v1708_v40  ;;  %v1900_v13 = vsub.f32 1.0, %v1836_v6  ;;  %v1901_v26 = vsub.f32 1.0, %v1837_v18 }
 0x2bb   : > { %2029 = vst [vmem:[%s3032_s23 + $0x1e8] sm:$0xff] %v1709_v10 }
 0x2bc   : > { %v1964_v24 = vmul.f32 %v1900_v13, %v1580_v8  ;;  %v1965_v31 = vmul.f32 %v1901_v26, %v1581_v56 }
 0x2bd   : > { %v812_v30 = vpop.f32.mrf.mxu0  ;;  %v925_v46 = vpop.f32.mrf.mxu1 }
 0x2be   : > { %2092 = vst [vmem:[%s3048_s12 + $0x1e0] sm:$0xff] %v1964_v24  ;;  %v1646_v5 = vsub.f32 1.0, %v812_v30  ;;  %v1647_v48 = vsub.f32 1.0, %v925_v46  ;;  %v1774_v25 = vadd.f32 %v1206_v15, %v812_v30  ;;  %v1775_v11 = vadd.f32 %v1319_v4, %v925_v46 }
 0x2bf   : > { %2093 = vst [vmem:[%s3048_s12 + $0x1e8] sm:$0xff] %v1965_v31 }
 0x2c0   : > { %v1710_v59 = vmul.f32 %v1646_v5, %v1582_v27  ;;  %v1711_v61 = vmul.f32 %v1647_v48, %v1583_v23  ;;  %v1838_v51 = vmul.f32 0.5, %v1774_v25  ;;  %v1839_v52 = vmul.f32 0.5, %v1775_v11 }
 0x2c2   : > { %2030 = vst [vmem:[%s3032_s23 + $0x1f0] sm:$0xff] %v1710_v59  ;;  %v1902_v32 = vsub.f32 1.0, %v1838_v51  ;;  %v1903_v63 = vsub.f32 1.0, %v1839_v52 }
 0x2c3   : > { %2031 = vst [vmem:[%s3032_s23 + $0x1f8] sm:$0xff] %v1711_v61 }
 0x2c4   : > { %v1966_v49 = vmul.f32 %v1902_v32, %v1582_v27  ;;  %v1967_v7 = vmul.f32 %v1903_v63, %v1583_v23 }
 0x2c5   : > { %2606 = shalt.err (!%p2603_p5)
}
 0x2c6   : > { %s2693_s23 = smov 256   ;;  %s2694_s30 = smov 16   ;;  %2094 = vst [vmem:[%s3048_s12 + $0x1f0] sm:$0xff] %v1966_v49 }
 0x2c7   : > { %2512 = dma.vmem_to_hbm [thread:$0]  (%p2775_p4), %s3476_s27, 8192, %s2122_s20, %s2097_s17, %s2693_s23, %s2693_s23, %s2694_s30  }
 0x2c8   : > { %2095 = vst [vmem:[%s3048_s12 + $0x1f8] sm:$0xff] %v1967_v7  ;;  %s2102_s0 = scalar_lea.sflag [#allocation5], %s3010_s16  ;;  %s2621_s1 = sshra.s32 %s2144_s10, 4  ;;  %s2622_s1 = int_to_ptr.hbm [resolvable:$true] %s2621_s1 }
 0x2c9   : > { %s2623_s15 = scalar_lea.hbm %s2622_s1, 512  ;;  %s2627_s21 = scalar_lea.hbm %s3536_s7, 1024 }
 0x2ca   : > { %p2624_p6 = scmp.ne.s32.totalorder %s2622_s1, %s2623_s15  ;;  %p2628_p10 = scmp.lt.s32.totalorder %s2622_s1, %s3536_s7 }
 0x2cb   : > { %p2629_p11 = scmp.lt.s32.totalorder %s2627_s21, %s2623_s15 }
 0x2cc   : > { %p2625_p7 = pnand %p2624_p6, %p2775_p4 }
 0x2cd   : > { %p2630_p12 = por %p2629_p11, %p2628_p10 }
 0x2ce   : > { %p2626_p9 = pneg %p2625_p7 }
 0x2d0   : > { %p2631_p13 = pnand %p2630_p12, %p2626_p9 }
 0x2d2   : > { %2634 = shalt.err (!%p2631_p13)
}
 0x2d3   : > { %2513 = dma.vmem_to_hbm [thread:$0]  (%p2775_p4), %s2142_s8, 8192, %s2144_s10, %s2102_s0, %s2693_s23, %s2693_s23, %s2694_s30  }
 0x2d4 PF: > { %p2523_p0 = scmp.ge.s32.totalorder %s2689_s29, 2  ;;  %s2158_s16 = sand.u32 1, %s2669_s24  }
 0x2d5   : > { %s2159_s12 = scalar_lea.sflag [#allocation3], %s2158_s16 }
 0x2d6   : > { %p2517_p1 = pnand %p2523_p0, %p2782_p8 }
 0x2d8   : > { %p2518_p2 = pneg %p2517_p1 }
 0x2da   : > { %2660 = dma.done.wait (%p2518_p2), %s2159_s12, 8192  }
 0x2db   : > { %2662 = vsyncadd (%p2518_p2), %s2159_s12, 4294959104  ;;  %s2169_s2 = scalar_lea.sflag [#allocation5], %s2158_s16 }
 0x2dc   : > { %2664 = dma.done.wait (%p2518_p2), %s2169_s2, 8192  }
 0x2dd   : > { %2666 = vsyncadd (%p2518_p2), %s2169_s2, 4294959104  ;;  %s24_s29 = sadd.s32 1, %s2689_s29   ;;  %s3545_s24 = smov %s2673_s25 }
 0x2de   : > { %p21_p3 = scmp.ge.s32.totalorder %s24_s29, 4   ;;  %s3546_s25 = smov %s2677_s26 }
 0x2df   : > { %s3547_s26 = smov %s2788_s14  ;;  %s3548_s27 = smov %s2685_s28 }
 0x2e0   : > { %s3549_s28 = smov %s3551_s9  ;;  %23 = sbr.rel (!%p21_p3) target bundleno = 10 (0xa), region = 111 }
 0x2e5   :  { %2175 = vsyncpa [#allocation3], 1 }
 0x2e6   :  { %2177 = vsyncpa [#allocation3 + $0x1], 1 }
 0x2e7   :  { %2178 = vsyncpa [#allocation5], 1 }
 0x2e8   :  { %2180 = vsyncpa [#allocation5 + $0x1], 1 }

</bundles_post_ra>
